<compile_context>
chip_gen: v7x
topology: tpu7x:2x2x1
jax: 0.10.0
libtpu: 0.0.40
codegen_flags: <defaults>
</compile_context>

<pallas_src>
import jax
import jax.numpy as jnp
from jax import lax
from jax.experimental import pallas as pl
from jax.experimental.pallas import tpu as pltpu

H, W = 12, 62            # conv input / output spatial size (padding=1, k=3)
HP, WP = 6, 31           # after 2x2 max pool
S = HP * WP              # 186 pooled spatial positions
NC = 32                  # conv output channels
FEAT = NC * S            # 32 * 6 * 31 = 5952
HID = 128
N_CLS = 2
BATCH_TILE = 16          # images per grid step (multiple of 8)


def _round_up(n, m):
    return ((n + m - 1) // m) * m


# ---------------------------------------------------------------------------
# Fused Pallas kernel: conv3x3 + bias + 2x2 maxpool + ReLU + fc1 + ReLU + fc2
# ---------------------------------------------------------------------------
def fused_cnn_kernel(planes_ref, wconv_ref, bconv_ref, w1_ref, b1_ref,
                     w2_ref, b2_ref, out_ref):
    """One batch tile of the whole forward pass.

    planes_ref : (4, 4, BT, 186) f32 VMEM.  planes_ref[r, q][b, ph*31+pw]
                 = x_padded[b, 2*ph + r, 2*pw + q]  (pool-grouped shifted views).
    wconv_ref  : (32, 9) f32 SMEM  (3x3 taps, row-major ky*3+kx).
    bconv_ref  : (32,)   f32 SMEM.
    w1_ref     : (32, 186, 128) bf16 VMEM (fc1 weight, channel-major slabs,
                 torch-flatten permutation pre-folded).
    b1_ref     : (1, 128) f32.   w2_ref: (128, 2) f32.   b2_ref: (1, 2) f32.
    out_ref    : (BT, 2) f32.
    """
    bt = planes_ref.shape[2]

    def one_channel(c, hidden):
        # 9 conv taps for channel c, read from SMEM once (reused for all 4
        # pool sub-positions).
        taps = [wconv_ref[c, t] for t in range(9)]

        # Plane-major accumulation: each of the 16 (BT, 186) plane views is
        # loaded once; acc[dy][dx] ends up equal to the conv output at pool
        # sub-position (dy, dx) (9 shifted MACs each), with only 4
        # accumulators + 1 plane live at any time.
        acc = [[None, None], [None, None]]
        for r in range(4):
            for q in range(4):
                p_rq = planes_ref[r, q]                      # (BT, 186) f32
                for dy in range(max(0, r - 2), min(1, r) + 1):
                    for dx in range(max(0, q - 2), min(1, q) + 1):
                        prod = p_rq * taps[(r - dy) * 3 + (q - dx)]
                        acc[dy][dx] = prod if acc[dy][dx] is None \
                            else acc[dy][dx] + prod

        m = jnp.maximum(jnp.maximum(acc[0][0], acc[0][1]),
                        jnp.maximum(acc[1][0], acc[1][1]))
        # bias hoisted out of the max; ReLU commutes with max.
        pooled_c = jnp.maximum(m + bconv_ref[c], 0.0)        # (BT, 186) f32

        # fc1 contribution of channel c on the MXU (bf16 in, f32 accumulate).
        w1_c = w1_ref[c]                                      # (186, 128) bf16
        return hidden + jnp.dot(pooled_c.astype(w1_c.dtype), w1_c,
                                preferred_element_type=jnp.float32)

    def pair_body(i, hidden):
        # Manual unroll x2: channel 2i+1's VPU conv can overlap channel 2i's
        # MXU matmul (only the fc1 accumulator is loop-carried).
        hidden = one_channel(2 * i, hidden)
        return one_channel(2 * i + 1, hidden)

    # fc1 bias folded into the accumulator init.
    hidden0 = jnp.broadcast_to(b1_ref[...].astype(jnp.float32), (bt, HID))
    hidden = lax.fori_loop(0, NC // 2, pair_body, hidden0)    # (BT, 128) f32

    h = jnp.maximum(hidden, 0.0)                               # fc1 ReLU
    out_ref[...] = (jnp.dot(h, w2_ref[...], preferred_element_type=jnp.float32)
                    + b2_ref[...])                             # fc2


# ---------------------------------------------------------------------------
# JAX wrapper (weight plumbing + pool-grouped plane views; no transposes of
# activations, no intermediate HBM activation tensors)
# ---------------------------------------------------------------------------
def cnn_model2_forward(x, params):
    assert x.shape[1:] == (1, H, W), x.shape
    B = x.shape[0]
    bt = min(BATCH_TILE, _round_up(B, 8))
    bp = _round_up(B, bt)

    x = x.astype(jnp.float32)
    if bp != B:
        x = jnp.pad(x, ((0, bp - B), (0, 0), (0, 0), (0, 0)))

    # pad H 12->14, W 62->64 (exactly 64 lanes).
    xpad = jnp.pad(x[:, 0], ((0, 0), (1, 1), (1, 1)))             # (bp, 14, 64)

    # 16 pool-grouped shifted views (r, q in 0..3), spatial flattened on lanes.
    planes = jnp.stack(
        [xpad[:, r:r + 2 * HP:2, q:q + 2 * WP:2].reshape(bp, S)
         for r in range(4) for q in range(4)], axis=0).reshape(4, 4, bp, S)

    wconv = params["conv_w"].reshape(NC, 9).astype(jnp.float32)    # (32, 9)
    bconv = params["conv_b"].astype(jnp.float32)                   # (32,)
    # Fold torch.flatten's (c, h, w) feature order into channel-major fc1 slabs.
    w1 = params["fc1_w"].T.reshape(NC, S, HID).astype(jnp.bfloat16)  # (32,186,128)
    b1 = params["fc1_b"].reshape(1, HID).astype(jnp.float32)
    w2 = params["fc2_w"].T.astype(jnp.float32)                     # (128, 2)
    b2 = params["fc2_b"].reshape(1, N_CLS).astype(jnp.float32)

    grid = (bp // bt,)
    flops = bp * (2 * H * W * NC * 9 + 2 * FEAT * HID + 2 * HID * N_CLS)
    bytes_accessed = (planes.size * 4 + w1.size * 2 + wconv.size * 4
                      + bconv.size * 4 + b1.size * 4 + w2.size * 4
                      + b2.size * 4 + bp * N_CLS * 4)

    out = pl.pallas_call(
        fused_cnn_kernel,
        out_shape=jax.ShapeDtypeStruct((bp, N_CLS), jnp.float32),
        grid=grid,
        in_specs=[
            pl.BlockSpec((4, 4, bt, S), lambda i: (0, 0, i, 0)),   # activations, tiled over batch
            pl.BlockSpec(memory_space=pltpu.MemorySpace.SMEM),     # conv taps (scalars)
            pl.BlockSpec(memory_space=pltpu.MemorySpace.SMEM),     # conv bias (scalars)
            pl.BlockSpec((NC, S, HID), lambda i: (0, 0, 0)),       # fc1 weight, VMEM-resident
            pl.BlockSpec((1, HID), lambda i: (0, 0)),              # fc1 bias
            pl.BlockSpec((HID, N_CLS), lambda i: (0, 0)),          # fc2 weight
            pl.BlockSpec((1, N_CLS), lambda i: (0, 0)),            # fc2 bias
        ],
        out_specs=pl.BlockSpec((bt, N_CLS), lambda i: (i, 0)),
        compiler_params=pltpu.CompilerParams(
            dimension_semantics=("parallel",)),
        cost_estimate=pl.CostEstimate(flops=flops, transcendentals=0,
                                      bytes_accessed=bytes_accessed),
    )(planes, wconv, bconv, w1, b1, w2, b2)
    return out[:B]


# ---------------------------------------------------------------------------
# Deterministic parameter init (same shapes as the PyTorch module)
# ---------------------------------------------------------------------------
def init_params(key):
    ks = jax.random.split(key, 6)

    def u(k, shape, fan_in):
        bound = 1.0 / (fan_in ** 0.5)
        return jax.random.uniform(k, shape, jnp.float32, -bound, bound)

    return {
        "conv_w": u(ks[0], (NC, 1, 3, 3), 9),
        "conv_b": u(ks[1], (NC,), 9),
        "fc1_w": u(ks[2], (HID, FEAT), FEAT),
        "fc1_b": u(ks[3], (HID,), FEAT),
        "fc2_w": u(ks[4], (N_CLS, HID), HID),
        "fc2_b": u(ks[5], (N_CLS,), HID),
    }


# Pure-JAX f32 reference (mirrors the PyTorch forward) for a correctness check.
def reference_forward(x, params):
    conv = jax.lax.conv_general_dilated(
        x, params["conv_w"], window_strides=(1, 1), padding="SAME",
        dimension_numbers=("NCHW", "OIHW", "NCHW"))
    conv = jax.nn.relu(conv + params["conv_b"][None, :, None, None])
    pooled = jax.lax.reduce_window(
        conv, -jnp.inf, jax.lax.max, (1, 1, 2, 2), (1, 1, 2, 2), "VALID")
    feat = pooled.reshape(x.shape[0], -1)
    h = jax.nn.relu(feat @ params["fc1_w"].T + params["fc1_b"])
    return h @ params["fc2_w"].T + params["fc2_b"]


if __name__ == "__main__":
    key = jax.random.PRNGKey(0)
    kx, kp = jax.random.split(key)
    x = jax.random.normal(kx, (2, 1, H, W), jnp.float32)    # (B=2, C=1, 12, 62)
    params = init_params(kp)

    fwd = jax.jit(cnn_model2_forward)
    out = jax.block_until_ready(fwd(x, params))

    ref = reference_forward(x, params)
    assert out.shape == (2, N_CLS), out.shape
    # fc1 runs in bf16 (weights + activations) with f32 accumulation, so allow
    # bf16-level tolerance against the pure-f32 reference.
    assert jnp.allclose(out, ref, atol=2e-2, rtol=2e-2), (out, ref)
    print("KERNEL_OK")
</pallas_src>

<mosaic_0001>
module attributes {stable_mosaic.version = 11 : i64} {
  func.func @fused_cnn_kernel(%arg0: i32, %arg1: memref<4x4x8x186xf32, #tpu.memory_space<vmem>>, %arg2: memref<32x9xf32, #tpu.memory_space<smem>>, %arg3: memref<32xf32, #tpu.memory_space<smem>>, %arg4: memref<32x186x128xbf16, #tpu.memory_space<vmem>>, %arg5: memref<1x128xf32, #tpu.memory_space<vmem>>, %arg6: memref<128x2xf32, #tpu.memory_space<vmem>>, %arg7: memref<1x2xf32, #tpu.memory_space<vmem>>, %arg8: memref<8x2xf32, #tpu.memory_space<vmem>>) attributes {dimension_semantics = [#tpu.dimension_semantics<parallel>], iteration_bounds = array<i64: 1>, scalar_prefetch = 0 : i64, scratch_operands = 0 : i64, tpu.core_type = #tpu.core_type<tc>, window_params = [{transform_indices = @transform_0, window_bounds = array<i64: 4, 4, 8, 186>}, {transform_indices = @transform_1, window_bounds = array<i64: 32, 9>}, {transform_indices = @transform_2, window_bounds = array<i64: 32>}, {pipeline_mode = #tpu.pipeline_mode<synchronous>, transform_indices = @transform_3, window_bounds = array<i64: 32, 186, 128>}, {pipeline_mode = #tpu.pipeline_mode<synchronous>, transform_indices = @transform_4, window_bounds = array<i64: 1, 128>}, {pipeline_mode = #tpu.pipeline_mode<synchronous>, transform_indices = @transform_5, window_bounds = array<i64: 128, 2>}, {pipeline_mode = #tpu.pipeline_mode<synchronous>, transform_indices = @transform_6, window_bounds = array<i64: 1, 2>}, {transform_indices = @transform_7, window_bounds = array<i64: 8, 2>}]} {
    %c0 = arith.constant 0 : index
    %c0_0 = arith.constant 0 : index
    %0 = vector.load %arg5[%c0, %c0_0] : memref<1x128xf32, #tpu.memory_space<vmem>>, vector<1x128xf32>
    %1 = vector.shape_cast %0 : vector<1x128xf32> to vector<1x128xf32>
    %2 = vector.broadcast %1 : vector<1x128xf32> to vector<8x128xf32>
    %c0_i32 = arith.constant 0 : i32
    %c16_i32 = arith.constant 16 : i32
    %3 = arith.addi %c0_i32, %c16_i32 : i32
    %c1_i32 = arith.constant 1 : i32
    %4 = scf.for %arg9 = %c0_i32 to %3 step %c1_i32 iter_args(%arg10 = %2) -> (vector<8x128xf32>)  : i32 {
      %c2_i32 = arith.constant 2 : i32
      %13 = arith.muli %c2_i32, %arg9 : i32
      %14 = arith.index_cast %13 : i32 to index
      %c0_9 = arith.constant 0 : index
      %15 = memref.load %arg2[%14, %c0_9] : memref<32x9xf32, #tpu.memory_space<smem>>
      %16 = arith.index_cast %13 : i32 to index
      %c1 = arith.constant 1 : index
      %17 = memref.load %arg2[%16, %c1] : memref<32x9xf32, #tpu.memory_space<smem>>
      %18 = arith.index_cast %13 : i32 to index
      %c2 = arith.constant 2 : index
      %19 = memref.load %arg2[%18, %c2] : memref<32x9xf32, #tpu.memory_space<smem>>
      %20 = arith.index_cast %13 : i32 to index
      %c3 = arith.constant 3 : index
      %21 = memref.load %arg2[%20, %c3] : memref<32x9xf32, #tpu.memory_space<smem>>
      %22 = arith.index_cast %13 : i32 to index
      %c4 = arith.constant 4 : index
      %23 = memref.load %arg2[%22, %c4] : memref<32x9xf32, #tpu.memory_space<smem>>
      %24 = arith.index_cast %13 : i32 to index
      %c5 = arith.constant 5 : index
      %25 = memref.load %arg2[%24, %c5] : memref<32x9xf32, #tpu.memory_space<smem>>
      %26 = arith.index_cast %13 : i32 to index
      %c6 = arith.constant 6 : index
      %27 = memref.load %arg2[%26, %c6] : memref<32x9xf32, #tpu.memory_space<smem>>
      %28 = arith.index_cast %13 : i32 to index
      %c7 = arith.constant 7 : index
      %29 = memref.load %arg2[%28, %c7] : memref<32x9xf32, #tpu.memory_space<smem>>
      %30 = arith.index_cast %13 : i32 to index
      %c8 = arith.constant 8 : index
      %31 = memref.load %arg2[%30, %c8] : memref<32x9xf32, #tpu.memory_space<smem>>
      %c0_10 = arith.constant 0 : index
      %c0_11 = arith.constant 0 : index
      %c0_12 = arith.constant 0 : index
      %c0_13 = arith.constant 0 : index
      %32 = vector.load %arg1[%c0_10, %c0_11, %c0_12, %c0_13] : memref<4x4x8x186xf32, #tpu.memory_space<vmem>>, vector<1x1x8x186xf32>
      %33 = vector.shape_cast %32 : vector<1x1x8x186xf32> to vector<8x186xf32>
      %34 = vector.broadcast %15 : f32 to vector<8x186xf32>
      %35 = arith.mulf %33, %34 : vector<8x186xf32>
      %c0_14 = arith.constant 0 : index
      %c1_15 = arith.constant 1 : index
      %c0_16 = arith.constant 0 : index
      %c0_17 = arith.constant 0 : index
      %36 = vector.load %arg1[%c0_14, %c1_15, %c0_16, %c0_17] : memref<4x4x8x186xf32, #tpu.memory_space<vmem>>, vector<1x1x8x186xf32>
      %37 = vector.shape_cast %36 : vector<1x1x8x186xf32> to vector<8x186xf32>
      %38 = vector.broadcast %17 : f32 to vector<8x186xf32>
      %39 = arith.mulf %37, %38 : vector<8x186xf32>
      %40 = arith.addf %35, %39 : vector<8x186xf32>
      %41 = vector.broadcast %15 : f32 to vector<8x186xf32>
      %42 = arith.mulf %37, %41 : vector<8x186xf32>
      %c0_18 = arith.constant 0 : index
      %c2_19 = arith.constant 2 : index
      %c0_20 = arith.constant 0 : index
      %c0_21 = arith.constant 0 : index
      %43 = vector.load %arg1[%c0_18, %c2_19, %c0_20, %c0_21] : memref<4x4x8x186xf32, #tpu.memory_space<vmem>>, vector<1x1x8x186xf32>
      %44 = vector.shape_cast %43 : vector<1x1x8x186xf32> to vector<8x186xf32>
      %45 = vector.broadcast %19 : f32 to vector<8x186xf32>
      %46 = arith.mulf %44, %45 : vector<8x186xf32>
      %47 = arith.addf %40, %46 : vector<8x186xf32>
      %48 = vector.broadcast %17 : f32 to vector<8x186xf32>
      %49 = arith.mulf %44, %48 : vector<8x186xf32>
      %50 = arith.addf %42, %49 : vector<8x186xf32>
      %c0_22 = arith.constant 0 : index
      %c3_23 = arith.constant 3 : index
      %c0_24 = arith.constant 0 : index
      %c0_25 = arith.constant 0 : index
      %51 = vector.load %arg1[%c0_22, %c3_23, %c0_24, %c0_25] : memref<4x4x8x186xf32, #tpu.memory_space<vmem>>, vector<1x1x8x186xf32>
      %52 = vector.shape_cast %51 : vector<1x1x8x186xf32> to vector<8x186xf32>
      %53 = vector.broadcast %19 : f32 to vector<8x186xf32>
      %54 = arith.mulf %52, %53 : vector<8x186xf32>
      %55 = arith.addf %50, %54 : vector<8x186xf32>
      %c1_26 = arith.constant 1 : index
      %c0_27 = arith.constant 0 : index
      %c0_28 = arith.constant 0 : index
      %c0_29 = arith.constant 0 : index
      %56 = vector.load %arg1[%c1_26, %c0_27, %c0_28, %c0_29] : memref<4x4x8x186xf32, #tpu.memory_space<vmem>>, vector<1x1x8x186xf32>
      %57 = vector.shape_cast %56 : vector<1x1x8x186xf32> to vector<8x186xf32>
      %58 = vector.broadcast %21 : f32 to vector<8x186xf32>
      %59 = arith.mulf %57, %58 : vector<8x186xf32>
      %60 = arith.addf %47, %59 : vector<8x186xf32>
      %61 = vector.broadcast %15 : f32 to vector<8x186xf32>
      %62 = arith.mulf %57, %61 : vector<8x186xf32>
      %c1_30 = arith.constant 1 : index
      %c1_31 = arith.constant 1 : index
      %c0_32 = arith.constant 0 : index
      %c0_33 = arith.constant 0 : index
      %63 = vector.load %arg1[%c1_30, %c1_31, %c0_32, %c0_33] : memref<4x4x8x186xf32, #tpu.memory_space<vmem>>, vector<1x1x8x186xf32>
      %64 = vector.shape_cast %63 : vector<1x1x8x186xf32> to vector<8x186xf32>
      %65 = vector.broadcast %23 : f32 to vector<8x186xf32>
      %66 = arith.mulf %64, %65 : vector<8x186xf32>
      %67 = arith.addf %60, %66 : vector<8x186xf32>
      %68 = vector.broadcast %21 : f32 to vector<8x186xf32>
      %69 = arith.mulf %64, %68 : vector<8x186xf32>
      %70 = arith.addf %55, %69 : vector<8x186xf32>
      %71 = vector.broadcast %17 : f32 to vector<8x186xf32>
      %72 = arith.mulf %64, %71 : vector<8x186xf32>
      %73 = arith.addf %62, %72 : vector<8x186xf32>
      %74 = vector.broadcast %15 : f32 to vector<8x186xf32>
      %75 = arith.mulf %64, %74 : vector<8x186xf32>
      %c1_34 = arith.constant 1 : index
      %c2_35 = arith.constant 2 : index
      %c0_36 = arith.constant 0 : index
      %c0_37 = arith.constant 0 : index
      %76 = vector.load %arg1[%c1_34, %c2_35, %c0_36, %c0_37] : memref<4x4x8x186xf32, #tpu.memory_space<vmem>>, vector<1x1x8x186xf32>
      %77 = vector.shape_cast %76 : vector<1x1x8x186xf32> to vector<8x186xf32>
      %78 = vector.broadcast %25 : f32 to vector<8x186xf32>
      %79 = arith.mulf %77, %78 : vector<8x186xf32>
      %80 = arith.addf %67, %79 : vector<8x186xf32>
      %81 = vector.broadcast %23 : f32 to vector<8x186xf32>
      %82 = arith.mulf %77, %81 : vector<8x186xf32>
      %83 = arith.addf %70, %82 : vector<8x186xf32>
      %84 = vector.broadcast %19 : f32 to vector<8x186xf32>
      %85 = arith.mulf %77, %84 : vector<8x186xf32>
      %86 = arith.addf %73, %85 : vector<8x186xf32>
      %87 = vector.broadcast %17 : f32 to vector<8x186xf32>
      %88 = arith.mulf %77, %87 : vector<8x186xf32>
      %89 = arith.addf %75, %88 : vector<8x186xf32>
      %c1_38 = arith.constant 1 : index
      %c3_39 = arith.constant 3 : index
      %c0_40 = arith.constant 0 : index
      %c0_41 = arith.constant 0 : index
      %90 = vector.load %arg1[%c1_38, %c3_39, %c0_40, %c0_41] : memref<4x4x8x186xf32, #tpu.memory_space<vmem>>, vector<1x1x8x186xf32>
      %91 = vector.shape_cast %90 : vector<1x1x8x186xf32> to vector<8x186xf32>
      %92 = vector.broadcast %25 : f32 to vector<8x186xf32>
      %93 = arith.mulf %91, %92 : vector<8x186xf32>
      %94 = arith.addf %83, %93 : vector<8x186xf32>
      %95 = vector.broadcast %19 : f32 to vector<8x186xf32>
      %96 = arith.mulf %91, %95 : vector<8x186xf32>
      %97 = arith.addf %89, %96 : vector<8x186xf32>
      %c2_42 = arith.constant 2 : index
      %c0_43 = arith.constant 0 : index
      %c0_44 = arith.constant 0 : index
      %c0_45 = arith.constant 0 : index
      %98 = vector.load %arg1[%c2_42, %c0_43, %c0_44, %c0_45] : memref<4x4x8x186xf32, #tpu.memory_space<vmem>>, vector<1x1x8x186xf32>
      %99 = vector.shape_cast %98 : vector<1x1x8x186xf32> to vector<8x186xf32>
      %100 = vector.broadcast %27 : f32 to vector<8x186xf32>
      %101 = arith.mulf %99, %100 : vector<8x186xf32>
      %102 = arith.addf %80, %101 : vector<8x186xf32>
      %103 = vector.broadcast %21 : f32 to vector<8x186xf32>
      %104 = arith.mulf %99, %103 : vector<8x186xf32>
      %105 = arith.addf %86, %104 : vector<8x186xf32>
      %c2_46 = arith.constant 2 : index
      %c1_47 = arith.constant 1 : index
      %c0_48 = arith.constant 0 : index
      %c0_49 = arith.constant 0 : index
      %106 = vector.load %arg1[%c2_46, %c1_47, %c0_48, %c0_49] : memref<4x4x8x186xf32, #tpu.memory_space<vmem>>, vector<1x1x8x186xf32>
      %107 = vector.shape_cast %106 : vector<1x1x8x186xf32> to vector<8x186xf32>
      %108 = vector.broadcast %29 : f32 to vector<8x186xf32>
      %109 = arith.mulf %107, %108 : vector<8x186xf32>
      %110 = arith.addf %102, %109 : vector<8x186xf32>
      %111 = vector.broadcast %27 : f32 to vector<8x186xf32>
      %112 = arith.mulf %107, %111 : vector<8x186xf32>
      %113 = arith.addf %94, %112 : vector<8x186xf32>
      %114 = vector.broadcast %23 : f32 to vector<8x186xf32>
      %115 = arith.mulf %107, %114 : vector<8x186xf32>
      %116 = arith.addf %105, %115 : vector<8x186xf32>
      %117 = vector.broadcast %21 : f32 to vector<8x186xf32>
      %118 = arith.mulf %107, %117 : vector<8x186xf32>
      %119 = arith.addf %97, %118 : vector<8x186xf32>
      %c2_50 = arith.constant 2 : index
      %c2_51 = arith.constant 2 : index
      %c0_52 = arith.constant 0 : index
      %c0_53 = arith.constant 0 : index
      %120 = vector.load %arg1[%c2_50, %c2_51, %c0_52, %c0_53] : memref<4x4x8x186xf32, #tpu.memory_space<vmem>>, vector<1x1x8x186xf32>
      %121 = vector.shape_cast %120 : vector<1x1x8x186xf32> to vector<8x186xf32>
      %122 = vector.broadcast %31 : f32 to vector<8x186xf32>
      %123 = arith.mulf %121, %122 : vector<8x186xf32>
      %124 = arith.addf %110, %123 : vector<8x186xf32>
      %125 = vector.broadcast %29 : f32 to vector<8x186xf32>
      %126 = arith.mulf %121, %125 : vector<8x186xf32>
      %127 = arith.addf %113, %126 : vector<8x186xf32>
      %128 = vector.broadcast %25 : f32 to vector<8x186xf32>
      %129 = arith.mulf %121, %128 : vector<8x186xf32>
      %130 = arith.addf %116, %129 : vector<8x186xf32>
      %131 = vector.broadcast %23 : f32 to vector<8x186xf32>
      %132 = arith.mulf %121, %131 : vector<8x186xf32>
      %133 = arith.addf %119, %132 : vector<8x186xf32>
      %c2_54 = arith.constant 2 : index
      %c3_55 = arith.constant 3 : index
      %c0_56 = arith.constant 0 : index
      %c0_57 = arith.constant 0 : index
      %134 = vector.load %arg1[%c2_54, %c3_55, %c0_56, %c0_57] : memref<4x4x8x186xf32, #tpu.memory_space<vmem>>, vector<1x1x8x186xf32>
      %135 = vector.shape_cast %134 : vector<1x1x8x186xf32> to vector<8x186xf32>
      %136 = vector.broadcast %31 : f32 to vector<8x186xf32>
      %137 = arith.mulf %135, %136 : vector<8x186xf32>
      %138 = arith.addf %127, %137 : vector<8x186xf32>
      %139 = vector.broadcast %25 : f32 to vector<8x186xf32>
      %140 = arith.mulf %135, %139 : vector<8x186xf32>
      %141 = arith.addf %133, %140 : vector<8x186xf32>
      %c3_58 = arith.constant 3 : index
      %c0_59 = arith.constant 0 : index
      %c0_60 = arith.constant 0 : index
      %c0_61 = arith.constant 0 : index
      %142 = vector.load %arg1[%c3_58, %c0_59, %c0_60, %c0_61] : memref<4x4x8x186xf32, #tpu.memory_space<vmem>>, vector<1x1x8x186xf32>
      %143 = vector.shape_cast %142 : vector<1x1x8x186xf32> to vector<8x186xf32>
      %144 = vector.broadcast %27 : f32 to vector<8x186xf32>
      %145 = arith.mulf %143, %144 : vector<8x186xf32>
      %146 = arith.addf %130, %145 : vector<8x186xf32>
      %c3_62 = arith.constant 3 : index
      %c1_63 = arith.constant 1 : index
      %c0_64 = arith.constant 0 : index
      %c0_65 = arith.constant 0 : index
      %147 = vector.load %arg1[%c3_62, %c1_63, %c0_64, %c0_65] : memref<4x4x8x186xf32, #tpu.memory_space<vmem>>, vector<1x1x8x186xf32>
      %148 = vector.shape_cast %147 : vector<1x1x8x186xf32> to vector<8x186xf32>
      %149 = vector.broadcast %29 : f32 to vector<8x186xf32>
      %150 = arith.mulf %148, %149 : vector<8x186xf32>
      %151 = arith.addf %146, %150 : vector<8x186xf32>
      %152 = vector.broadcast %27 : f32 to vector<8x186xf32>
      %153 = arith.mulf %148, %152 : vector<8x186xf32>
      %154 = arith.addf %141, %153 : vector<8x186xf32>
      %c3_66 = arith.constant 3 : index
      %c2_67 = arith.constant 2 : index
      %c0_68 = arith.constant 0 : index
      %c0_69 = arith.constant 0 : index
      %155 = vector.load %arg1[%c3_66, %c2_67, %c0_68, %c0_69] : memref<4x4x8x186xf32, #tpu.memory_space<vmem>>, vector<1x1x8x186xf32>
      %156 = vector.shape_cast %155 : vector<1x1x8x186xf32> to vector<8x186xf32>
      %157 = vector.broadcast %31 : f32 to vector<8x186xf32>
      %158 = arith.mulf %156, %157 : vector<8x186xf32>
      %159 = arith.addf %151, %158 : vector<8x186xf32>
      %160 = vector.broadcast %29 : f32 to vector<8x186xf32>
      %161 = arith.mulf %156, %160 : vector<8x186xf32>
      %162 = arith.addf %154, %161 : vector<8x186xf32>
      %c3_70 = arith.constant 3 : index
      %c3_71 = arith.constant 3 : index
      %c0_72 = arith.constant 0 : index
      %c0_73 = arith.constant 0 : index
      %163 = vector.load %arg1[%c3_70, %c3_71, %c0_72, %c0_73] : memref<4x4x8x186xf32, #tpu.memory_space<vmem>>, vector<1x1x8x186xf32>
      %164 = vector.shape_cast %163 : vector<1x1x8x186xf32> to vector<8x186xf32>
      %165 = vector.broadcast %31 : f32 to vector<8x186xf32>
      %166 = arith.mulf %164, %165 : vector<8x186xf32>
      %167 = arith.addf %162, %166 : vector<8x186xf32>
      %168 = arith.maximumf %124, %138 : vector<8x186xf32>
      %169 = arith.maximumf %159, %167 : vector<8x186xf32>
      %170 = arith.maximumf %168, %169 : vector<8x186xf32>
      %171 = arith.index_cast %13 : i32 to index
      %172 = memref.load %arg3[%171] : memref<32xf32, #tpu.memory_space<smem>>
      %173 = vector.broadcast %172 : f32 to vector<8x186xf32>
      %174 = arith.addf %170, %173 : vector<8x186xf32>
      %cst_74 = arith.constant 0.000000e+00 : f32
      %175 = vector.broadcast %cst_74 : f32 to vector<8x186xf32>
      %176 = arith.maximumf %174, %175 : vector<8x186xf32>
      %177 = arith.index_cast %13 : i32 to index
      %c0_75 = arith.constant 0 : index
      %c0_76 = arith.constant 0 : index
      %178 = vector.load %arg4[%177, %c0_75, %c0_76] : memref<32x186x128xbf16, #tpu.memory_space<vmem>>, vector<1x186x128xbf16>
      %179 = vector.shape_cast %178 : vector<1x186x128xbf16> to vector<186x128xbf16>
      %180 = arith.truncf %176 : vector<8x186xf32> to vector<8x186xbf16>
      %cst_77 = arith.constant dense<0.000000e+00> : vector<8x128xf32>
      %181 = tpu.matmul %180, %179, %cst_77 {dimension_numbers = #tpu.dot_dimension_numbers<[1], [0], [0], [1], [0, 0, 1, 1], [], []>} : vector<8x186xbf16>, vector<186x128xbf16>, vector<8x128xf32> -> vector<8x128xf32>
      %182 = arith.addf %arg10, %181 : vector<8x128xf32>
      %c2_i32_78 = arith.constant 2 : i32
      %183 = arith.muli %c2_i32_78, %arg9 : i32
      %c1_i32_79 = arith.constant 1 : i32
      %184 = arith.addi %183, %c1_i32_79 : i32
      %185 = arith.index_cast %184 : i32 to index
      %c0_80 = arith.constant 0 : index
      %186 = memref.load %arg2[%185, %c0_80] : memref<32x9xf32, #tpu.memory_space<smem>>
      %187 = arith.index_cast %184 : i32 to index
      %c1_81 = arith.constant 1 : index
      %188 = memref.load %arg2[%187, %c1_81] : memref<32x9xf32, #tpu.memory_space<smem>>
      %189 = arith.index_cast %184 : i32 to index
      %c2_82 = arith.constant 2 : index
      %190 = memref.load %arg2[%189, %c2_82] : memref<32x9xf32, #tpu.memory_space<smem>>
      %191 = arith.index_cast %184 : i32 to index
      %c3_83 = arith.constant 3 : index
      %192 = memref.load %arg2[%191, %c3_83] : memref<32x9xf32, #tpu.memory_space<smem>>
      %193 = arith.index_cast %184 : i32 to index
      %c4_84 = arith.constant 4 : index
      %194 = memref.load %arg2[%193, %c4_84] : memref<32x9xf32, #tpu.memory_space<smem>>
      %195 = arith.index_cast %184 : i32 to index
      %c5_85 = arith.constant 5 : index
      %196 = memref.load %arg2[%195, %c5_85] : memref<32x9xf32, #tpu.memory_space<smem>>
      %197 = arith.index_cast %184 : i32 to index
      %c6_86 = arith.constant 6 : index
      %198 = memref.load %arg2[%197, %c6_86] : memref<32x9xf32, #tpu.memory_space<smem>>
      %199 = arith.index_cast %184 : i32 to index
      %c7_87 = arith.constant 7 : index
      %200 = memref.load %arg2[%199, %c7_87] : memref<32x9xf32, #tpu.memory_space<smem>>
      %201 = arith.index_cast %184 : i32 to index
      %c8_88 = arith.constant 8 : index
      %202 = memref.load %arg2[%201, %c8_88] : memref<32x9xf32, #tpu.memory_space<smem>>
      %c0_89 = arith.constant 0 : index
      %c0_90 = arith.constant 0 : index
      %c0_91 = arith.constant 0 : index
      %c0_92 = arith.constant 0 : index
      %203 = vector.load %arg1[%c0_89, %c0_90, %c0_91, %c0_92] : memref<4x4x8x186xf32, #tpu.memory_space<vmem>>, vector<1x1x8x186xf32>
      %204 = vector.shape_cast %203 : vector<1x1x8x186xf32> to vector<8x186xf32>
      %205 = vector.broadcast %186 : f32 to vector<8x186xf32>
      %206 = arith.mulf %204, %205 : vector<8x186xf32>
      %c0_93 = arith.constant 0 : index
      %c1_94 = arith.constant 1 : index
      %c0_95 = arith.constant 0 : index
      %c0_96 = arith.constant 0 : index
      %207 = vector.load %arg1[%c0_93, %c1_94, %c0_95, %c0_96] : memref<4x4x8x186xf32, #tpu.memory_space<vmem>>, vector<1x1x8x186xf32>
      %208 = vector.shape_cast %207 : vector<1x1x8x186xf32> to vector<8x186xf32>
      %209 = vector.broadcast %188 : f32 to vector<8x186xf32>
      %210 = arith.mulf %208, %209 : vector<8x186xf32>
      %211 = arith.addf %206, %210 : vector<8x186xf32>
      %212 = vector.broadcast %186 : f32 to vector<8x186xf32>
      %213 = arith.mulf %208, %212 : vector<8x186xf32>
      %c0_97 = arith.constant 0 : index
      %c2_98 = arith.constant 2 : index
      %c0_99 = arith.constant 0 : index
      %c0_100 = arith.constant 0 : index
      %214 = vector.load %arg1[%c0_97, %c2_98, %c0_99, %c0_100] : memref<4x4x8x186xf32, #tpu.memory_space<vmem>>, vector<1x1x8x186xf32>
      %215 = vector.shape_cast %214 : vector<1x1x8x186xf32> to vector<8x186xf32>
      %216 = vector.broadcast %190 : f32 to vector<8x186xf32>
      %217 = arith.mulf %215, %216 : vector<8x186xf32>
      %218 = arith.addf %211, %217 : vector<8x186xf32>
      %219 = vector.broadcast %188 : f32 to vector<8x186xf32>
      %220 = arith.mulf %215, %219 : vector<8x186xf32>
      %221 = arith.addf %213, %220 : vector<8x186xf32>
      %c0_101 = arith.constant 0 : index
      %c3_102 = arith.constant 3 : index
      %c0_103 = arith.constant 0 : index
      %c0_104 = arith.constant 0 : index
      %222 = vector.load %arg1[%c0_101, %c3_102, %c0_103, %c0_104] : memref<4x4x8x186xf32, #tpu.memory_space<vmem>>, vector<1x1x8x186xf32>
      %223 = vector.shape_cast %222 : vector<1x1x8x186xf32> to vector<8x186xf32>
      %224 = vector.broadcast %190 : f32 to vector<8x186xf32>
      %225 = arith.mulf %223, %224 : vector<8x186xf32>
      %226 = arith.addf %221, %225 : vector<8x186xf32>
      %c1_105 = arith.constant 1 : index
      %c0_106 = arith.constant 0 : index
      %c0_107 = arith.constant 0 : index
      %c0_108 = arith.constant 0 : index
      %227 = vector.load %arg1[%c1_105, %c0_106, %c0_107, %c0_108] : memref<4x4x8x186xf32, #tpu.memory_space<vmem>>, vector<1x1x8x186xf32>
      %228 = vector.shape_cast %227 : vector<1x1x8x186xf32> to vector<8x186xf32>
      %229 = vector.broadcast %192 : f32 to vector<8x186xf32>
      %230 = arith.mulf %228, %229 : vector<8x186xf32>
      %231 = arith.addf %218, %230 : vector<8x186xf32>
      %232 = vector.broadcast %186 : f32 to vector<8x186xf32>
      %233 = arith.mulf %228, %232 : vector<8x186xf32>
      %c1_109 = arith.constant 1 : index
      %c1_110 = arith.constant 1 : index
      %c0_111 = arith.constant 0 : index
      %c0_112 = arith.constant 0 : index
      %234 = vector.load %arg1[%c1_109, %c1_110, %c0_111, %c0_112] : memref<4x4x8x186xf32, #tpu.memory_space<vmem>>, vector<1x1x8x186xf32>
      %235 = vector.shape_cast %234 : vector<1x1x8x186xf32> to vector<8x186xf32>
      %236 = vector.broadcast %194 : f32 to vector<8x186xf32>
      %237 = arith.mulf %235, %236 : vector<8x186xf32>
      %238 = arith.addf %231, %237 : vector<8x186xf32>
      %239 = vector.broadcast %192 : f32 to vector<8x186xf32>
      %240 = arith.mulf %235, %239 : vector<8x186xf32>
      %241 = arith.addf %226, %240 : vector<8x186xf32>
      %242 = vector.broadcast %188 : f32 to vector<8x186xf32>
      %243 = arith.mulf %235, %242 : vector<8x186xf32>
      %244 = arith.addf %233, %243 : vector<8x186xf32>
      %245 = vector.broadcast %186 : f32 to vector<8x186xf32>
      %246 = arith.mulf %235, %245 : vector<8x186xf32>
      %c1_113 = arith.constant 1 : index
      %c2_114 = arith.constant 2 : index
      %c0_115 = arith.constant 0 : index
      %c0_116 = arith.constant 0 : index
      %247 = vector.load %arg1[%c1_113, %c2_114, %c0_115, %c0_116] : memref<4x4x8x186xf32, #tpu.memory_space<vmem>>, vector<1x1x8x186xf32>
      %248 = vector.shape_cast %247 : vector<1x1x8x186xf32> to vector<8x186xf32>
      %249 = vector.broadcast %196 : f32 to vector<8x186xf32>
      %250 = arith.mulf %248, %249 : vector<8x186xf32>
      %251 = arith.addf %238, %250 : vector<8x186xf32>
      %252 = vector.broadcast %194 : f32 to vector<8x186xf32>
      %253 = arith.mulf %248, %252 : vector<8x186xf32>
      %254 = arith.addf %241, %253 : vector<8x186xf32>
      %255 = vector.broadcast %190 : f32 to vector<8x186xf32>
      %256 = arith.mulf %248, %255 : vector<8x186xf32>
      %257 = arith.addf %244, %256 : vector<8x186xf32>
      %258 = vector.broadcast %188 : f32 to vector<8x186xf32>
      %259 = arith.mulf %248, %258 : vector<8x186xf32>
      %260 = arith.addf %246, %259 : vector<8x186xf32>
      %c1_117 = arith.constant 1 : index
      %c3_118 = arith.constant 3 : index
      %c0_119 = arith.constant 0 : index
      %c0_120 = arith.constant 0 : index
      %261 = vector.load %arg1[%c1_117, %c3_118, %c0_119, %c0_120] : memref<4x4x8x186xf32, #tpu.memory_space<vmem>>, vector<1x1x8x186xf32>
      %262 = vector.shape_cast %261 : vector<1x1x8x186xf32> to vector<8x186xf32>
      %263 = vector.broadcast %196 : f32 to vector<8x186xf32>
      %264 = arith.mulf %262, %263 : vector<8x186xf32>
      %265 = arith.addf %254, %264 : vector<8x186xf32>
      %266 = vector.broadcast %190 : f32 to vector<8x186xf32>
      %267 = arith.mulf %262, %266 : vector<8x186xf32>
      %268 = arith.addf %260, %267 : vector<8x186xf32>
      %c2_121 = arith.constant 2 : index
      %c0_122 = arith.constant 0 : index
      %c0_123 = arith.constant 0 : index
      %c0_124 = arith.constant 0 : index
      %269 = vector.load %arg1[%c2_121, %c0_122, %c0_123, %c0_124] : memref<4x4x8x186xf32, #tpu.memory_space<vmem>>, vector<1x1x8x186xf32>
      %270 = vector.shape_cast %269 : vector<1x1x8x186xf32> to vector<8x186xf32>
      %271 = vector.broadcast %198 : f32 to vector<8x186xf32>
      %272 = arith.mulf %270, %271 : vector<8x186xf32>
      %273 = arith.addf %251, %272 : vector<8x186xf32>
      %274 = vector.broadcast %192 : f32 to vector<8x186xf32>
      %275 = arith.mulf %270, %274 : vector<8x186xf32>
      %276 = arith.addf %257, %275 : vector<8x186xf32>
      %c2_125 = arith.constant 2 : index
      %c1_126 = arith.constant 1 : index
      %c0_127 = arith.constant 0 : index
      %c0_128 = arith.constant 0 : index
      %277 = vector.load %arg1[%c2_125, %c1_126, %c0_127, %c0_128] : memref<4x4x8x186xf32, #tpu.memory_space<vmem>>, vector<1x1x8x186xf32>
      %278 = vector.shape_cast %277 : vector<1x1x8x186xf32> to vector<8x186xf32>
      %279 = vector.broadcast %200 : f32 to vector<8x186xf32>
      %280 = arith.mulf %278, %279 : vector<8x186xf32>
      %281 = arith.addf %273, %280 : vector<8x186xf32>
      %282 = vector.broadcast %198 : f32 to vector<8x186xf32>
      %283 = arith.mulf %278, %282 : vector<8x186xf32>
      %284 = arith.addf %265, %283 : vector<8x186xf32>
      %285 = vector.broadcast %194 : f32 to vector<8x186xf32>
      %286 = arith.mulf %278, %285 : vector<8x186xf32>
      %287 = arith.addf %276, %286 : vector<8x186xf32>
      %288 = vector.broadcast %192 : f32 to vector<8x186xf32>
      %289 = arith.mulf %278, %288 : vector<8x186xf32>
      %290 = arith.addf %268, %289 : vector<8x186xf32>
      %c2_129 = arith.constant 2 : index
      %c2_130 = arith.constant 2 : index
      %c0_131 = arith.constant 0 : index
      %c0_132 = arith.constant 0 : index
      %291 = vector.load %arg1[%c2_129, %c2_130, %c0_131, %c0_132] : memref<4x4x8x186xf32, #tpu.memory_space<vmem>>, vector<1x1x8x186xf32>
      %292 = vector.shape_cast %291 : vector<1x1x8x186xf32> to vector<8x186xf32>
      %293 = vector.broadcast %202 : f32 to vector<8x186xf32>
      %294 = arith.mulf %292, %293 : vector<8x186xf32>
      %295 = arith.addf %281, %294 : vector<8x186xf32>
      %296 = vector.broadcast %200 : f32 to vector<8x186xf32>
      %297 = arith.mulf %292, %296 : vector<8x186xf32>
      %298 = arith.addf %284, %297 : vector<8x186xf32>
      %299 = vector.broadcast %196 : f32 to vector<8x186xf32>
      %300 = arith.mulf %292, %299 : vector<8x186xf32>
      %301 = arith.addf %287, %300 : vector<8x186xf32>
      %302 = vector.broadcast %194 : f32 to vector<8x186xf32>
      %303 = arith.mulf %292, %302 : vector<8x186xf32>
      %304 = arith.addf %290, %303 : vector<8x186xf32>
      %c2_133 = arith.constant 2 : index
      %c3_134 = arith.constant 3 : index
      %c0_135 = arith.constant 0 : index
      %c0_136 = arith.constant 0 : index
      %305 = vector.load %arg1[%c2_133, %c3_134, %c0_135, %c0_136] : memref<4x4x8x186xf32, #tpu.memory_space<vmem>>, vector<1x1x8x186xf32>
      %306 = vector.shape_cast %305 : vector<1x1x8x186xf32> to vector<8x186xf32>
      %307 = vector.broadcast %202 : f32 to vector<8x186xf32>
      %308 = arith.mulf %306, %307 : vector<8x186xf32>
      %309 = arith.addf %298, %308 : vector<8x186xf32>
      %310 = vector.broadcast %196 : f32 to vector<8x186xf32>
      %311 = arith.mulf %306, %310 : vector<8x186xf32>
      %312 = arith.addf %304, %311 : vector<8x186xf32>
      %c3_137 = arith.constant 3 : index
      %c0_138 = arith.constant 0 : index
      %c0_139 = arith.constant 0 : index
      %c0_140 = arith.constant 0 : index
      %313 = vector.load %arg1[%c3_137, %c0_138, %c0_139, %c0_140] : memref<4x4x8x186xf32, #tpu.memory_space<vmem>>, vector<1x1x8x186xf32>
      %314 = vector.shape_cast %313 : vector<1x1x8x186xf32> to vector<8x186xf32>
      %315 = vector.broadcast %198 : f32 to vector<8x186xf32>
      %316 = arith.mulf %314, %315 : vector<8x186xf32>
      %317 = arith.addf %301, %316 : vector<8x186xf32>
      %c3_141 = arith.constant 3 : index
      %c1_142 = arith.constant 1 : index
      %c0_143 = arith.constant 0 : index
      %c0_144 = arith.constant 0 : index
      %318 = vector.load %arg1[%c3_141, %c1_142, %c0_143, %c0_144] : memref<4x4x8x186xf32, #tpu.memory_space<vmem>>, vector<1x1x8x186xf32>
      %319 = vector.shape_cast %318 : vector<1x1x8x186xf32> to vector<8x186xf32>
      %320 = vector.broadcast %200 : f32 to vector<8x186xf32>
      %321 = arith.mulf %319, %320 : vector<8x186xf32>
      %322 = arith.addf %317, %321 : vector<8x186xf32>
      %323 = vector.broadcast %198 : f32 to vector<8x186xf32>
      %324 = arith.mulf %319, %323 : vector<8x186xf32>
      %325 = arith.addf %312, %324 : vector<8x186xf32>
      %c3_145 = arith.constant 3 : index
      %c2_146 = arith.constant 2 : index
      %c0_147 = arith.constant 0 : index
      %c0_148 = arith.constant 0 : index
      %326 = vector.load %arg1[%c3_145, %c2_146, %c0_147, %c0_148] : memref<4x4x8x186xf32, #tpu.memory_space<vmem>>, vector<1x1x8x186xf32>
      %327 = vector.shape_cast %326 : vector<1x1x8x186xf32> to vector<8x186xf32>
      %328 = vector.broadcast %202 : f32 to vector<8x186xf32>
      %329 = arith.mulf %327, %328 : vector<8x186xf32>
      %330 = arith.addf %322, %329 : vector<8x186xf32>
      %331 = vector.broadcast %200 : f32 to vector<8x186xf32>
      %332 = arith.mulf %327, %331 : vector<8x186xf32>
      %333 = arith.addf %325, %332 : vector<8x186xf32>
      %c3_149 = arith.constant 3 : index
      %c3_150 = arith.constant 3 : index
      %c0_151 = arith.constant 0 : index
      %c0_152 = arith.constant 0 : index
      %334 = vector.load %arg1[%c3_149, %c3_150, %c0_151, %c0_152] : memref<4x4x8x186xf32, #tpu.memory_space<vmem>>, vector<1x1x8x186xf32>
      %335 = vector.shape_cast %334 : vector<1x1x8x186xf32> to vector<8x186xf32>
      %336 = vector.broadcast %202 : f32 to vector<8x186xf32>
      %337 = arith.mulf %335, %336 : vector<8x186xf32>
      %338 = arith.addf %333, %337 : vector<8x186xf32>
      %339 = arith.maximumf %295, %309 : vector<8x186xf32>
      %340 = arith.maximumf %330, %338 : vector<8x186xf32>
      %341 = arith.maximumf %339, %340 : vector<8x186xf32>
      %342 = arith.index_cast %184 : i32 to index
      %343 = memref.load %arg3[%342] : memref<32xf32, #tpu.memory_space<smem>>
      %344 = vector.broadcast %343 : f32 to vector<8x186xf32>
      %345 = arith.addf %341, %344 : vector<8x186xf32>
      %cst_153 = arith.constant 0.000000e+00 : f32
      %346 = vector.broadcast %cst_153 : f32 to vector<8x186xf32>
      %347 = arith.maximumf %345, %346 : vector<8x186xf32>
      %348 = arith.index_cast %184 : i32 to index
      %c0_154 = arith.constant 0 : index
      %c0_155 = arith.constant 0 : index
      %349 = vector.load %arg4[%348, %c0_154, %c0_155] : memref<32x186x128xbf16, #tpu.memory_space<vmem>>, vector<1x186x128xbf16>
      %350 = vector.shape_cast %349 : vector<1x186x128xbf16> to vector<186x128xbf16>
      %351 = arith.truncf %347 : vector<8x186xf32> to vector<8x186xbf16>
      %cst_156 = arith.constant dense<0.000000e+00> : vector<8x128xf32>
      %352 = tpu.matmul %351, %350, %cst_156 {dimension_numbers = #tpu.dot_dimension_numbers<[1], [0], [0], [1], [0, 0, 1, 1], [], []>} : vector<8x186xbf16>, vector<186x128xbf16>, vector<8x128xf32> -> vector<8x128xf32>
      %353 = arith.addf %182, %352 : vector<8x128xf32>
      scf.yield %353 : vector<8x128xf32>
    }
    %c16_i32_1 = arith.constant 16 : i32
    %cst = arith.constant 0.000000e+00 : f32
    %5 = vector.broadcast %cst : f32 to vector<8x128xf32>
    %6 = arith.maximumf %4, %5 : vector<8x128xf32>
    %c0_2 = arith.constant 0 : index
    %c0_3 = arith.constant 0 : index
    %7 = vector.load %arg6[%c0_2, %c0_3] : memref<128x2xf32, #tpu.memory_space<vmem>>, vector<128x2xf32>
    %cst_4 = arith.constant dense<0.000000e+00> : vector<8x2xf32>
    %8 = tpu.matmul %6, %7, %cst_4 {dimension_numbers = #tpu.dot_dimension_numbers<[1], [0], [0], [1], [0, 0, 1, 1], [], []>} : vector<8x128xf32>, vector<128x2xf32>, vector<8x2xf32> -> vector<8x2xf32>
    %c0_5 = arith.constant 0 : index
    %c0_6 = arith.constant 0 : index
    %9 = vector.load %arg7[%c0_5, %c0_6] : memref<1x2xf32, #tpu.memory_space<vmem>>, vector<1x2xf32>
    %10 = vector.broadcast %9 : vector<1x2xf32> to vector<8x2xf32>
    %11 = arith.addf %8, %10 : vector<8x2xf32>
    %c0_7 = arith.constant 0 : index
    %c0_8 = arith.constant 0 : index
    %12 = vector.load %arg8[%c0_7, %c0_8] : memref<8x2xf32, #tpu.memory_space<vmem>>, vector<8x2xf32>
    tpu.vector_store %arg8[%c0_7, %c0_8], %11 {strides = array<i32>} : memref<8x2xf32, #tpu.memory_space<vmem>>, vector<8x2xf32>,
    return
  }
  func.func @transform_0(%arg0: i32) -> (i32, i32, i32, i32) {
    %c0_i32 = arith.constant 0 : i32
    %c0_i32_0 = arith.constant 0 : i32
    %c0_i32_1 = arith.constant 0 : i32
    %c0_i32_2 = arith.constant 0 : i32
    return %c0_i32, %c0_i32_0, %arg0, %c0_i32_1 : i32, i32, i32, i32
  }
  func.func @transform_1(%arg0: i32) -> (i32, i32) {
    %c0_i32 = arith.constant 0 : i32
    %c0_i32_0 = arith.constant 0 : i32
    %c0_i32_1 = arith.constant 0 : i32
    return %c0_i32, %c0_i32_0 : i32, i32
  }
  func.func @transform_2(%arg0: i32) -> i32 {
    %c0_i32 = arith.constant 0 : i32
    %c0_i32_0 = arith.constant 0 : i32
    return %c0_i32 : i32
  }
  func.func @transform_3(%arg0: i32) -> (i32, i32, i32) {
    %c0_i32 = arith.constant 0 : i32
    %c0_i32_0 = arith.constant 0 : i32
    %c0_i32_1 = arith.constant 0 : i32
    %c0_i32_2 = arith.constant 0 : i32
    return %c0_i32, %c0_i32_0, %c0_i32_1 : i32, i32, i32
  }
  func.func @transform_4(%arg0: i32) -> (i32, i32) {
    %c0_i32 = arith.constant 0 : i32
    %c0_i32_0 = arith.constant 0 : i32
    %c0_i32_1 = arith.constant 0 : i32
    return %c0_i32, %c0_i32_0 : i32, i32
  }
  func.func @transform_5(%arg0: i32) -> (i32, i32) {
    %c0_i32 = arith.constant 0 : i32
    %c0_i32_0 = arith.constant 0 : i32
    %c0_i32_1 = arith.constant 0 : i32
    return %c0_i32, %c0_i32_0 : i32, i32
  }
  func.func @transform_6(%arg0: i32) -> (i32, i32) {
    %c0_i32 = arith.constant 0 : i32
    %c0_i32_0 = arith.constant 0 : i32
    %c0_i32_1 = arith.constant 0 : i32
    return %c0_i32, %c0_i32_0 : i32, i32
  }
  func.func @transform_7(%arg0: i32) -> (i32, i32) {
    %c0_i32 = arith.constant 0 : i32
    %c0_i32_0 = arith.constant 0 : i32
    return %arg0, %c0_i32 : i32, i32
  }
}

</mosaic_0001>

<bundles_post_ra>
// kernel: cnn_model2_forward.1
= control target key start
LH: loop header
LB: loop body
LE: loop exit
PB: predicated region body
PF: predicated region fallthrough
CT: control target
= control target key end

     0   :  { %12 = vsyncpa [#allocation3], 0  ;;  %s1907_s0 = inlined_call_operand.vmem [shape: f32[4,4,8,186], index: 0, kind: input, shape index: {}]   ;;  %s1908_s1 = inlined_call_operand.vmem [shape: f32[32,9], index: 1, kind: input, shape index: {}]   ;;  %s1909_s2 = inlined_call_operand.vmem [shape: f32[32], index: 2, kind: input, shape index: {}]   ;;  %s1910_s3 = inlined_call_operand.vmem [shape: bf16[32,186,128], index: 3, kind: input, shape index: {}]   ;;  %s1911_s4 = inlined_call_operand.vmem [shape: f32[1,128], index: 4, kind: input, shape index: {}]   ;;  %s1912_s5 = inlined_call_operand.vmem [shape: f32[128,2], index: 5, kind: input, shape index: {}]   ;;  %s1913_s6 = inlined_call_operand.vmem [shape: f32[1,2], index: 6, kind: input, shape index: {}]   ;;  %s1914_s7 = inlined_call_operand.vmem [shape: f32[8,2], index: 7, kind: output, shape index: {}]  }
   0x1   :  { %s21_s26 = sshll.u32 %s1908_s1, 4  ;;  %s22_s26 = int_to_ptr.vmem [resolvable:$true] %s21_s26 }
   0x2   :  { %13 = vsyncpa [#allocation5], 0  ;;  %s34_s29 = sshll.u32 %s1909_s2, 4  ;;  %s1099_s30 = scalar_lea.vmem %s22_s26, 512  ;;  %s35_s29 = int_to_ptr.vmem [resolvable:$true] %s34_s29 }
   0x3   :  { %p1100_p0 = scmp.ne.s32.totalorder %s22_s26, %s1099_s30  ;;  %p1104_p1 = scmp.lt.s32.totalorder %s22_s26, %s22_s26 }
   0x4   :  { %p1105_p2 = scmp.lt.s32.totalorder %s1099_s30, %s1099_s30 }
   0x6   :  { %p1106_p3 = por %p1105_p2, %p1104_p1 }
   0x8   :  { %p1107_p4 = pnand %p1106_p3, %p1100_p0 }
   0xa   :  { %1110 = shalt.err (!%p1107_p4)
}
   0xb   :  { %s1143_s8 = smov [#allocation2]   ;;  %s1144_s9 = smov 128  }
   0xc   :  { %s1145_s10 = smov 8   ;;  %s1111_s11 = scalar_lea.vmem %s35_s29, 16 }
   0xd   :  { %27 = dma.vmem_to_smem %s22_s26, 512, %s1143_s8, [#allocation3], %s1144_s9, %s1144_s9, %s1145_s10  }
   0xe   :  { %p1112_p5 = scmp.ne.s32.totalorder %s35_s29, %s1111_s11  ;;  %p1116_p6 = scmp.lt.s32.totalorder %s35_s29, %s35_s29 }
   0xf   :  { %p1117_p7 = scmp.lt.s32.totalorder %s1111_s11, %s1111_s11 }
  0x11   :  { %p1118_p8 = por %p1117_p7, %p1116_p6 }
  0x13   :  { %p1119_p9 = pnand %p1118_p8, %p1112_p5 }
  0x15   :  { %1122 = shalt.err (!%p1119_p9)
}
  0x16   :  { %s1146_s1 = smov [#allocation4]  }
  0x17   :  { %37 = dma.vmem_to_smem %s35_s29, 16, %s1146_s1, [#allocation5]  }
  0x18   :  { %1131 = dma.done.wait [#allocation3], 512  }
  0x19   :  { %1132 = vsyncadd [#allocation3], 4294966784 }
  0x1a   :  { %1133 = dma.done.wait [#allocation5], 16  }
  0x1b   :  { %1134 = vsyncadd [#allocation5], 4294967280 }
  0x1c   :  { %52 = sfence }
  0x1d   :  { %v879_v0 = vld [vmem:[%s1911_s4] ss:$0 sm:$0xff]   ;;  %s1202_s13 = smov 0  }
  0x1e LB: > { %1919 = vst [vmem:[#allocation8_spill] sm:$0xff] %v1137_v0  ;;  %v1147_v1 = vmov 0   ;;  %s969_s4 = smul.u32 192, %s1141_s13  ;;  %s880_s14 = sshll.u32 %s1141_s13, 1  ;;  %v1231_v4 = vld [vmem:[%s1907_s0] sm:$0xff]  ;;  %v1236_v5 = vld [vmem:[%s1907_s0 + $0x8] sm:$0xff]  ;;  %s1141_s13 = sphi %s1202_s13, %s66_s13   ;;  %v1137_v0 = vphi %v879_v0, %v1929_v0  }
  0x1f   : > { %399 = vmatprep.subr.bf16.mxu1 %v1147_v1  ;;  %722 = vmatprep.subr.bf16.mxu0 %v1147_v1  ;;  %s1215_s15 = sshll.u32 %s1141_s13, 8  ;;  %v1243_v7 = vld [vmem:[%s1907_s0 + $0x10] sm:$0xff]  ;;  %v1248_v8 = vld [vmem:[%s1907_s0 + $0x18] sm:$0xff]  ;;  %v1253_v9 = vld [vmem:[%s1907_s0 + $0x40] sm:$0xff]  ;;  %s1363_s11 = sld [smem:[#allocation4 + %s880_s14]]  ;;  %vm395_vm0 = vcmask 1044480  }
  0x20   : > { %s1220_s18 = scalar_lea.vmem %s1910_s3, %s969_s4  ;;  %s70_s19 = sld [smem:[#allocation2 + %s1215_s15]]  ;;  %v1262_v11 = vld [vmem:[%s1907_s0 + $0x20] sm:$0xff]  ;;  %v1267_v12 = vld [vmem:[%s1907_s0 + $0x28] sm:$0xff]  ;;  %v1279_v14 = vld [vmem:[%s1907_s0 + $0x50] sm:$0xff]  ;;  %vm391_vm1 = vcmask 474112  }
  0x21   : > { %v1075_v2 = vld [vmem:[%s1220_s18] sm:$0xff]   ;;  %s71_s20 = sadd.s32 1, %s1215_s15  ;;  %v1077_v6 = vld [vmem:[%s1220_s18 + $0x8] sm:$0xff]   ;;  %s73_s26 = sadd.s32 2, %s1215_s15  ;;  %v1288_v16 = vld [vmem:[%s1907_s0 + $0x58] sm:$0xff] }
  0x22   : > { %v1076_v3 = vld [vmem:[%s1220_s18 + $0x60] sm:$0xff]   ;;  %s1226_s21 = sld [smem:[#allocation2 + %s71_s20]]  ;;  %400 = vmatpush1.bf16.msra.mxu1 %v1075_v2  ;;  %v1078_v10 = vld [vmem:[%s1220_s18 + $0x68] sm:$0xff]   ;;  %s75_s4 = sadd.s32 3, %s1215_s15  ;;  %v1079_v17 = vld [vmem:[%s1220_s18 + $0x10] sm:$0xff]  }
  0x23   : > { %723 = vmatpush1.bf16.msra.mxu0 %v1076_v3  ;;  %401 = vmatprep.subr.bf16.mxu1 %v1147_v1  ;;  %s1257_s10 = sld [smem:[#allocation2 + %s73_s26]]  ;;  %v1274_v13 = vld [vmem:[%s1907_s0 + $0x48] sm:$0xff]  ;;  %s77_s26 = sadd.s32 4, %s1215_s15  ;;  %v1080_v20 = vld [vmem:[%s1220_s18 + $0x70] sm:$0xff]   ;;  %v1334_v31 = vld [vmem:[%s1907_s0 + $0x38] sm:$0xff] }
  0x24   : > { %724 = vmatprep.subr.bf16.mxu0 %v1147_v1  ;;  %s1281_s23 = sld [smem:[#allocation2 + %s75_s4]]  ;;  %s79_s27 = sadd.s32 5, %s1215_s15  ;;  %v1324_v29 = vld [vmem:[%s1907_s0 + $0x30] sm:$0xff]  ;;  %v1081_v35 = vld [vmem:[%s1220_s18 + $0x18] sm:$0xff]   ;;  %v1083_v49 = vld [vmem:[%s1220_s18 + $0x20] sm:$0xff]  }
  0x25   : > { %s1326_s29 = sld [smem:[#allocation2 + %s79_s27]]  ;;  %s81_s9 = sadd.s32 6, %s1215_s15  ;;  %v1082_v40 = vld [vmem:[%s1220_s18 + $0x78] sm:$0xff]   ;;  %v1385_v58 = vld [vmem:[%s1907_s0 + $0x60] sm:$0xff] }
  0x26   : > { %v1283_v15 = vstv %s70_s19  ;;  %402 = vmatpush1.bf16.msra.mxu1 %v1077_v6  ;;  %s1298_s19 = sld [smem:[#allocation2 + %s77_s26]]  ;;  %s85_s12 = sadd.s32 8, %s1215_s15  ;;  %v1084_v59 = vld [vmem:[%s1220_s18 + $0x80] sm:$0xff]  }
  0x27   : > { %v90_v18 = vmul.f32 %v1283_v15, %v1231_v4  ;;  %v91_v19 = vmul.f32 %v1283_v15, %v1236_v5  ;;  %725 = vmatpush1.bf16.msra.mxu0 %v1078_v10  ;;  %403 = vmatprep.subr.bf16.mxu1 %v1147_v1  ;;  %v100_v22 = vmul.f32 %v1243_v7, %v1283_v15  ;;  %s1366_s1 = sld [smem:[#allocation2 + %s81_s9]]  ;;  %v1404_v10 = vld [vmem:[%s1907_s0 + $0x68] sm:$0xff]  ;;  %s1417_s25 = sadd.s32 128, %s1215_s15 }
  0x28   : > { %v1301_v21 = vstv %s1226_s21  ;;  %v101_v23 = vmul.f32 %v1248_v8, %v1283_v15  ;;  %v1309_v24 = vmul.f32 %v1253_v9, %v1283_v15  ;;  %726 = vmatprep.subr.bf16.mxu0 %v1147_v1  ;;  %v130_v32 = vmul.f32 %v1274_v13, %v1283_v15  ;;  %s1389_s17 = sld [smem:[#allocation2 + %s85_s12]]  ;;  %s445_s27 = sadd.s32 2, %s1417_s25 }
  0x29   : > { %v96_v25 = vmul.f32 %v1243_v7, %v1301_v21  ;;  %v97_v26 = vmul.f32 %v1248_v8, %v1301_v21  ;;  %v110_v27 = vmul.f32 %v1262_v11, %v1301_v21  ;;  %v111_v28 = vmul.f32 %v1267_v12, %v1301_v21  ;;  %s1425_s26 = sld [smem:[#allocation2 + %s1417_s25]]  ;;  %s449_s20 = sadd.s32 4, %s1417_s25 }
  0x2a   : > { %v1329_v30 = vstv %s1257_s10  ;;  %v143_v33 = vmul.f32 %v1279_v14, %v1301_v21  ;;  %v144_v34 = vmul.f32 %v1288_v16, %v1301_v21  ;;  %404 = vmatpush1.bf16.msra.mxu1 %v1079_v17  ;;  %v1353_v44 = vstv %s1281_s23  ;;  %s83_s10 = sadd.s32 7, %s1215_s15  ;;  %s443_s15 = sadd.s32 1, %s1417_s25 }
  0x2b   : > { %v98_v36 = vadd.f32 %v96_v25, %v90_v18  ;;  %v99_v37 = vadd.f32 %v97_v26, %v91_v19  ;;  %v106_v38 = vmul.f32 %v1262_v11, %v1329_v30  ;;  %v107_v39 = vmul.f32 %v1267_v12, %v1329_v30  ;;  %727 = vmatpush1.bf16.msra.mxu0 %v1080_v20  ;;  %s1375_s2 = sld [smem:[#allocation2 + %s83_s10]]  ;;  %s457_s28 = sadd.s32 8, %s1417_s25 }
  0x2c   : > { %405 = vmatprep.subr.bf16.mxu1 %v1147_v1  ;;  %v112_v41 = vadd.f32 %v110_v27, %v100_v22  ;;  %v113_v42 = vadd.f32 %v111_v28, %v101_v23  ;;  %v117_v43 = vmul.f32 %v1324_v29, %v1329_v30  ;;  %728 = vmatprep.subr.bf16.mxu0 %v1147_v1  ;;  %v1371_v52 = vstv %s1298_s19  ;;  %v1414_v22 = vld [vmem:[%s1907_s0 + $0x70] sm:$0xff]  ;;  %v1086_v27 = vld [vmem:[%s1220_s18 + $0x88] sm:$0xff]   ;;  %s1441_s19 = sld [smem:[#allocation2 + %s443_s15]]  ;;  %s66_s13 = sadd.s32 1, %s1141_s13  }
  0x2d   : > { %v108_v45 = vadd.f32 %v106_v38, %v98_v36  ;;  %v109_v46 = vadd.f32 %v107_v39, %v99_v37  ;;  %v118_v47 = vmul.f32 %v1334_v31, %v1329_v30  ;;  %v125_v48 = vmul.f32 %v1253_v9, %v1353_v44  ;;  %v1088_v38 = vld [vmem:[%s1220_s18 + $0x90] sm:$0xff]   ;;  %s1480_s10 = sld [smem:[#allocation2 + %s445_s27]]  ;;  %s455_s27 = sadd.s32 7, %s1417_s25 }
  0x2e   : > { %v119_v50 = vadd.f32 %v117_v43, %v112_v41  ;;  %v126_v51 = vmul.f32 %v1274_v13, %v1353_v44  ;;  %v139_v53 = vmul.f32 %v1279_v14, %v1353_v44  ;;  %406 = vmatpush1.bf16.msra.mxu1 %v1081_v35  ;;  %v135_v56 = vmul.f32 %v1279_v14, %v1371_v52  ;;  %v1097_v43 = vld [vmem:[%s1220_s18 + $0x58] sm:$0x1f]   ;;  %s1550_s15 = sld [smem:[#allocation2 + %s449_s20]]  ;;  %p63_p10 = scmp.ge.s32.totalorder %s66_s13, 16  }
  0x2f   : > { %v120_v54 = vadd.f32 %v118_v47, %v113_v42  ;;  %v127_v55 = vadd.f32 %v125_v48, %v108_v45  ;;  %v136_v57 = vmul.f32 %v1288_v16, %v1371_v52  ;;  %729 = vmatpush1.bf16.msra.mxu0 %v1082_v40  ;;  %407 = vmatprep.subr.bf16.mxu1 %v1147_v1  ;;  %v1394_v62 = vstv %s1326_s29  ;;  %v1098_v48 = vld [vmem:[%s1220_s18 + $0xb8] sm:$0x1f]   ;;  %s440_s29 = sadd.s32 1, %s880_s14 }
  0x30   : > { %v128_v60 = vadd.f32 %v126_v51, %v109_v46  ;;  %v140_v61 = vmul.f32 %v1288_v16, %v1353_v44  ;;  %730 = vmatprep.subr.bf16.mxu0 %v1147_v1  ;;  %v141_v2 = vadd.f32 %v139_v53, %v119_v50  ;;  %v147_v3 = vmul.f32 %v1279_v14, %v1283_v15  ;;  %s610_s14 = sld [smem:[#allocation4 + %s440_s29]] }
  0x31   : > { %v137_v63 = vadd.f32 %v135_v56, %v127_v55  ;;  %v148_v6 = vmul.f32 %v1288_v16, %v1283_v15  ;;  %v145_v17 = vadd.f32 %v143_v33, %v1309_v24  ;;  %v146_v18 = vadd.f32 %v144_v34, %v130_v32  ;;  %v1085_v15 = vld [vmem:[%s1220_s18 + $0x28] sm:$0xff]   ;;  %v1087_v34 = vld [vmem:[%s1220_s18 + $0x30] sm:$0xff]   ;;  %v1468_v55 = vld [vmem:[%s1907_s0 + $0x78] sm:$0xff] }
  0x32   : > { %v153_v19 = vmul.f32 %v1385_v58, %v1394_v62  ;;  %v157_v20 = vmul.f32 %v1385_v58, %v1371_v52  ;;  %408 = vmatpush1.bf16.msra.mxu1 %v1083_v49  ;;  %v138_v23 = vadd.f32 %v136_v57, %v128_v60  ;;  %v142_v24 = vadd.f32 %v140_v61, %v120_v54  ;;  %v1478_v60 = vld [vmem:[%s1907_s0 + $0x88] sm:$0xff] }
  0x33   : > { %v154_v25 = vmul.f32 %v1404_v10, %v1394_v62  ;;  %v158_v26 = vmul.f32 %v1404_v10, %v1371_v52  ;;  %731 = vmatpush1.bf16.msra.mxu0 %v1084_v59  ;;  %409 = vmatprep.subr.bf16.mxu1 %v1147_v1  ;;  %v161_v28 = vmul.f32 %v1385_v58, %v1329_v30  ;;  %v1449_v42 = vstv %s1366_s1  ;;  %v1473_v59 = vld [vmem:[%s1907_s0 + $0x80] sm:$0xff]  ;;  %s447_s1 = sadd.s32 3, %s1417_s25 }
  0x34   : > { %v162_v32 = vmul.f32 %v1404_v10, %v1329_v30  ;;  %v165_v33 = vmul.f32 %v1385_v58, %v1301_v21  ;;  %732 = vmatprep.subr.bf16.mxu0 %v1147_v1  ;;  %v159_v35 = vadd.f32 %v157_v20, %v141_v2  ;;  %v166_v36 = vmul.f32 %v1404_v10, %v1301_v21 }
  0x35   : > { %v172_v40 = vmul.f32 %v1414_v22, %v1394_v62  ;;  %v176_v41 = vmul.f32 %v1414_v22, %v1329_v30  ;;  %v155_v45 = vadd.f32 %v153_v19, %v137_v63  ;;  %v156_v21 = vadd.f32 %v154_v25, %v138_v23  ;;  %v1090_v23 = vld [vmem:[%s1220_s18 + $0x98] sm:$0xff]  }
  0x36   : > { %v167_v39 = vadd.f32 %v165_v33, %v147_v3  ;;  %410 = vmatpush1.bf16.msra.mxu1 %v1085_v15  ;;  %v160_v46 = vadd.f32 %v158_v26, %v142_v24  ;;  %v1454_v47 = vstv %s1375_s2  ;;  %v163_v49 = vadd.f32 %v161_v28, %v145_v17  ;;  %v1498_v17 = vld [vmem:[%s1907_s0 + $0x90] sm:$0xff] }
  0x37   : > { %733 = vmatpush1.bf16.msra.mxu0 %v1086_v27  ;;  %411 = vmatprep.subr.bf16.mxu1 %v1147_v1  ;;  %v164_v50 = vadd.f32 %v162_v32, %v146_v18  ;;  %v168_v51 = vadd.f32 %v166_v36, %v148_v6  ;;  %v1459_v53 = vstv %s1389_s17  ;;  %v1463_v54 = vsel %vm395_vm0, %v1097_v43, 0  ;;  %v1089_v18 = vld [vmem:[%s1220_s18 + $0x38] sm:$0xff]   ;;  %s1516_s17 = sld [smem:[#allocation2 + %s447_s1]] }
  0x38   : > { %734 = vmatprep.subr.bf16.mxu0 %v1147_v1  ;;  %v174_v56 = vadd.f32 %v172_v40, %v159_v35  ;;  %v178_v57 = vadd.f32 %v176_v41, %v167_v39  ;;  %v1484_v61 = vstv %s1425_s26  ;;  %v1487_v63 = vsel %vm395_vm0, %v1098_v48, 0  ;;  %v1514_v27 = vld [vmem:[%s1907_s0 + $0x98] sm:$0xff]  ;;  %v1091_v41 = vld [vmem:[%s1220_s18 + $0x40] sm:$0xff]  }
  0x39   : > { %v173_v2 = vmul.f32 %v1468_v55, %v1394_v62  ;;  %v177_v3 = vmul.f32 %v1468_v55, %v1329_v30  ;;  %v184_v6 = vmul.f32 %v1473_v59, %v1449_v42  ;;  %v185_v19 = vmul.f32 %v1478_v60, %v1449_v42  ;;  %v1092_v48 = vld [vmem:[%s1220_s18 + $0xa0] sm:$0xff]  }
  0x3a   : > { %412 = vmatpush1.bf16.msra.mxu1 %v1087_v34  ;;  %v188_v20 = vmul.f32 %v1473_v59, %v1353_v44  ;;  %v189_v30 = vmul.f32 %v1478_v60, %v1353_v44  ;;  %v196_v15 = vmul.f32 %v1498_v17, %v1454_v47  ;;  %v1519_v28 = vstv %s1441_s19  ;;  %s451_s19 = sadd.s32 5, %s1417_s25 }
  0x3b   : > { %735 = vmatpush1.bf16.msra.mxu0 %v1088_v38  ;;  %413 = vmatprep.subr.bf16.mxu1 %v1147_v1  ;;  %v175_v24 = vadd.f32 %v173_v2, %v160_v46  ;;  %v179_v25 = vadd.f32 %v177_v3, %v168_v51  ;;  %v186_v26 = vadd.f32 %v184_v6, %v155_v45  ;;  %v1543_v2 = vld [vmem:[%s1907_s0 + $0xa0] sm:$0xff]  ;;  %v1548_v3 = vld [vmem:[%s1907_s0 + $0xa8] sm:$0xff]  ;;  %s1600_s1 = sld [smem:[#allocation2 + %s451_s19]]  ;;  %v1646_v37 = vstv %s1550_s15  ;;  %s453_s15 = sadd.s32 6, %s1417_s25 }
  0x3c   : > { %736 = vmatprep.subr.bf16.mxu0 %v1147_v1  ;;  %v187_v32 = vadd.f32 %v185_v19, %v156_v21  ;;  %v190_v33 = vadd.f32 %v188_v20, %v163_v49  ;;  %v191_v34 = vadd.f32 %v189_v30, %v164_v50  ;;  %v197_v35 = vmul.f32 %v1514_v27, %v1454_v47  ;;  %s1732_s21 = sld [smem:[#allocation2 + %s453_s15]] }
  0x3d   : > { %v198_v36 = vadd.f32 %v196_v15, %v186_v26  ;;  %v200_v38 = vmul.f32 %v1498_v17, %v1449_v42  ;;  %v201_v39 = vmul.f32 %v1514_v27, %v1449_v42  ;;  %v204_v40 = vmul.f32 %v1498_v17, %v1371_v52  ;;  %s1762_s25 = sld [smem:[#allocation2 + %s457_s28]] }
  0x3e   : > { %414 = vmatpush1.bf16.msra.mxu1 %v1089_v18  ;;  %v199_v43 = vadd.f32 %v197_v35, %v187_v32  ;;  %v205_v45 = vmul.f32 %v1514_v27, %v1371_v52  ;;  %v208_v21 = vmul.f32 %v1498_v17, %v1353_v44  ;;  %v209_v46 = vmul.f32 %v1514_v27, %v1353_v44  ;;  %v1094_v35 = vld [vmem:[%s1220_s18 + $0xa8] sm:$0xff]  }
  0x3f   : > { %737 = vmatpush1.bf16.msra.mxu0 %v1090_v23  ;;  %415 = vmatprep.subr.bf16.mxu1 %v1147_v1  ;;  %v202_v49 = vadd.f32 %v200_v38, %v174_v56  ;;  %v203_v50 = vadd.f32 %v201_v39, %v175_v24  ;;  %v206_v51 = vadd.f32 %v204_v40, %v190_v33  ;;  %v1553_v44 = vstv %s1480_s10  ;;  %v1579_v33 = vld [vmem:[%s1907_s0 + $0xb0] sm:$0xff]  ;;  %v1598_v40 = vld [vmem:[%s1907_s0 + $0xc8] sm:$0xff] }
  0x40   : > { %738 = vmatprep.subr.bf16.mxu0 %v1147_v1  ;;  %v207_v56 = vadd.f32 %v205_v45, %v191_v34  ;;  %v210_v6 = vadd.f32 %v208_v21, %v178_v57  ;;  %v211_v18 = vadd.f32 %v209_v46, %v179_v25  ;;  %v216_v19 = vmul.f32 %v1543_v2, %v1459_v53  ;;  %v1093_v57 = vld [vmem:[%s1220_s18 + $0x48] sm:$0xff]   ;;  %v1584_v34 = vld [vmem:[%s1907_s0 + $0xb8] sm:$0xff] }
  0x41   : > { %v217_v20 = vmul.f32 %v1548_v3, %v1459_v53  ;;  %v220_v30 = vmul.f32 %v1543_v2, %v1454_v47  ;;  %v221_v15 = vmul.f32 %v1548_v3, %v1454_v47  ;;  %v224_v23 = vmul.f32 %v1543_v2, %v1394_v62  ;;  %1921 = vst [vmem:[#allocation10_spill] sm:$0xff] %v1598_v40 }
  0x42   : > { %416 = vmatpush1.bf16.msra.mxu1 %v1091_v41  ;;  %v1568_v24 = vadd.f32 %v216_v19, %v198_v36  ;;  %v225_v25 = vmul.f32 %v1548_v3, %v1394_v62  ;;  %v228_v26 = vmul.f32 %v1543_v2, %v1371_v52  ;;  %v229_v32 = vmul.f32 %v1548_v3, %v1371_v52  ;;  %v1593_v52 = vld [vmem:[%s1907_s0 + $0xc0] sm:$0xff] }
  0x43   : > { %739 = vmatpush1.bf16.msra.mxu0 %v1092_v48  ;;  %417 = vmatprep.subr.bf16.mxu1 %v1147_v1  ;;  %v1588_v36 = vadd.f32 %v217_v20, %v199_v43  ;;  %v222_v38 = vadd.f32 %v220_v30, %v202_v49  ;;  %v223_v39 = vadd.f32 %v221_v15, %v203_v50  ;;  %v1603_v41 = vstv %s1516_s17  ;;  %v1636_v15 = vld [vmem:[%s1907_s0 + $0xe0] sm:$0xff] }
  0x44   : > { %1920 = vst [vmem:[#allocation9_spill] sm:$0xff] %v1593_v52  ;;  %740 = vmatprep.subr.bf16.mxu0 %v1147_v1  ;;  %v226_v43 = vadd.f32 %v224_v23, %v206_v51  ;;  %v227_v45 = vadd.f32 %v225_v25, %v207_v56  ;;  %v230_v21 = vadd.f32 %v228_v26, %v210_v6  ;;  %v1617_v51 = vld [vmem:[%s1907_s0 + $0xd0] sm:$0xff]  ;;  %v1622_v56 = vld [vmem:[%s1907_s0 + $0xd8] sm:$0xff]  ;;  %vm1149_vm2 = vmmov (%p63_p10), 0  }
  0x45   : > { %v231_v46 = vadd.f32 %v229_v32, %v211_v18  ;;  %v235_v48 = vmul.f32 %v1579_v33, %v1459_v53  ;;  %v236_v49 = vmul.f32 %v1584_v34, %v1459_v53  ;;  %v239_v50 = vmul.f32 %v1579_v33, %v1394_v62  ;;  %1922 = vst [vmem:[#allocation11_spill] sm:$0xff] %v1622_v56  ;;  %v1095_v6 = vld [vmem:[%s1220_s18 + $0x50] sm:$0xff]   ;;  %v1643_v32 = vld [vmem:[%s1907_s0 + $0xe8] sm:$0xff] }
  0x46   : > { %v240_v19 = vmul.f32 %v1584_v34, %v1394_v62  ;;  %418 = vmatpush1.bf16.msra.mxu1 %v1093_v57  ;;  %v246_v18 = vmul.f32 %v1593_v52, %v1449_v42  ;;  %v247_v20 = vmul.f32 %v1598_v40, %v1449_v42  ;;  %v253_v62 = vmul.f32 %v1617_v51, %v1454_v47  ;;  %v1096_v23 = vld [vmem:[%s1220_s18 + $0xb0] sm:$0xff]  }
  0x47   : > { %v254_v30 = vmul.f32 %v1622_v56, %v1454_v47  ;;  %741 = vmatpush1.bf16.msra.mxu0 %v1094_v35  ;;  %419 = vmatprep.subr.bf16.mxu1 %v1147_v1  ;;  %v237_v57 = vadd.f32 %v235_v48, %v222_v38  ;;  %v238_v25 = vadd.f32 %v236_v49, %v223_v39  ;;  %v1654_v38 = vld [vmem:[%s1907_s0 + $0xf0] sm:$0xff]  ;;  %v1659_v39 = vld [vmem:[%s1907_s0 + $0xf8] sm:$0xff]  ;;  %vm857_vm3 = vcmask (%p63_p10), 15360  }
  0x48   : > { %v241_v26 = vadd.f32 %v239_v50, %v230_v21  ;;  %742 = vmatprep.subr.bf16.mxu0 %v1147_v1  ;;  %v242_v0 = vadd.f32 %v240_v19, %v231_v46  ;;  %v248_v40 = vadd.f32 %v246_v18, %v226_v43  ;;  %v249_v52 = vadd.f32 %v247_v20, %v227_v45 }
  0x49   : > { %v257_v35 = vmul.f32 %v1617_v51, %v1449_v42  ;;  %v258_v21 = vmul.f32 %v1622_v56, %v1449_v42  ;;  %v264_v43 = vmul.f32 %v1636_v15, %v1459_v53  ;;  %v265_v45 = vmul.f32 %v1643_v32, %v1459_v53 }
  0x4a   : > { %v268_v46 = vmul.f32 %v1636_v15, %v1454_v47  ;;  %420 = vmatpush1.bf16.msra.mxu1 %v1095_v6  ;;  %v255_v48 = vadd.f32 %v253_v62, %v248_v40  ;;  %v256_v49 = vadd.f32 %v254_v30, %v249_v52  ;;  %v269_v19 = vmul.f32 %v1643_v32, %v1454_v47 }
  0x4b   : > { %v259_v50 = vadd.f32 %v257_v35, %v241_v26  ;;  %743 = vmatpush1.bf16.msra.mxu0 %v1096_v23  ;;  %421 = vmatprep.subr.bf16.mxu1 %v1147_v1  ;;  %v260_v42 = vadd.f32 %v258_v21, %v242_v0  ;;  %v275_v18 = vmul.f32 %v1654_v38, %v1459_v53  ;;  %v1677_v56 = vstv %s1600_s1 }
  0x4c   : > { %v276_v20 = vmul.f32 %v1659_v39, %v1459_v53  ;;  %744 = vmatprep.subr.bf16.mxu0 %v1147_v1  ;;  %v266_v40 = vadd.f32 %v264_v43, %v255_v48  ;;  %v267_v52 = vadd.f32 %v265_v45, %v256_v49  ;;  %v279_v62 = vmax.f32 %v1568_v24, %v237_v57 }
  0x4d   : > { %v270_v6 = vadd.f32 %v268_v46, %v259_v50  ;;  %v271_v47 = vadd.f32 %v269_v19, %v260_v42  ;;  %v280_v30 = vmax.f32 %v1588_v36, %v238_v25  ;;  %v460_v0 = vmul.f32 %v1484_v61, %v1231_v4 }
  0x4e   : > { %v461_v23 = vmul.f32 %v1484_v61, %v1236_v5  ;;  %422 = vmatpush1.bf16.msra.mxu1 %v1463_v54  ;;  %v463_v1 = vmul.f32 %v1243_v7, %v1519_v28  ;;  %v464_v26 = vmul.f32 %v1248_v8, %v1519_v28  ;;  %v467_v24 = vmul.f32 %v1243_v7, %v1484_v61 }
  0x4f   : > { %v277_v53 = vadd.f32 %v275_v18, %v270_v6  ;;  %745 = vmatpush1.bf16.msra.mxu0 %v1487_v63  ;;  %v278_v36 = vadd.f32 %v276_v20, %v271_v47  ;;  %v468_v4 = vmul.f32 %v1248_v8, %v1484_v61  ;;  %v470_v5 = vmul.f32 %v1262_v11, %v1553_v44 }
  0x50   : > { %v471_v54 = vmul.f32 %v1267_v12, %v1553_v44  ;;  %v465_v25 = vadd.f32 %v463_v1, %v460_v0  ;;  %v466_v35 = vadd.f32 %v464_v26, %v461_v23  ;;  %v474_v7 = vmul.f32 %v1262_v11, %v1519_v28 }
  0x51   : > { %v281_v57 = vmax.f32 %v266_v40, %v277_v53  ;;  %v282_v63 = vmax.f32 %v267_v52, %v278_v36  ;;  %v475_v8 = vmul.f32 %v1267_v12, %v1519_v28  ;;  %v478_v21 = vmul.f32 %v1324_v29, %v1553_v44 }
  0x52   : > { %v479_v43 = vmul.f32 %v1334_v31, %v1553_v44  ;;  %v472_v46 = vadd.f32 %v470_v5, %v465_v25  ;;  %v473_v48 = vadd.f32 %v471_v54, %v466_v35  ;;  %v476_v49 = vadd.f32 %v474_v7, %v467_v24 }
  0x53   : > { %v283_v45 = vmax.f32 %v279_v62, %v281_v57  ;;  %v284_v50 = vmax.f32 %v280_v30, %v282_v63  ;;  %v477_v19 = vadd.f32 %v475_v8, %v468_v4  ;;  %v483_v11 = vmul.f32 %v1253_v9, %v1603_v41 }
  0x54   : > { %v484_v42 = vmul.f32 %v1274_v13, %v1603_v41  ;;  %v1923_v12 = vstv %s1363_s11  ;;  %v480_v29 = vadd.f32 %v478_v21, %v476_v49  ;;  %v487_v31 = vmul.f32 %v1253_v9, %v1484_v61  ;;  %s1734_s11 = sld [smem:[#allocation2 + %s455_s27]] }
  0x55   : > { %v1714_v18 = vadd.f32 %v1923_v12, %v283_v45  ;;  %v488_v20 = vmul.f32 %v1274_v13, %v1484_v61  ;;  %v1924_v40 = vmov %v1923_v12  ;;  %v481_v6 = vadd.f32 %v479_v43, %v477_v19 }
  0x56   : > { %v288_v52 = vadd.f32 %v1924_v40, %v284_v50  ;;  %v485_v62 = vadd.f32 %v483_v11, %v472_v46  ;;  %v486_v47 = vadd.f32 %v484_v42, %v473_v48  ;;  %v490_v30 = vmul.f32 %v1279_v14, %v1646_v37 }
  0x57   : > { %v491_v0 = vmul.f32 %v1288_v16, %v1646_v37  ;;  %v494_v23 = vmul.f32 %v1279_v14, %v1603_v41  ;;  %v495_v9 = vmul.f32 %v1288_v16, %v1603_v41  ;;  %v498_v13 = vmul.f32 %v1279_v14, %v1519_v28 }
  0x58   : > { %v290_v53 = vmax.f32 %v288_v52, 0.0  ;;  %v499_v1 = vmul.f32 %v1288_v16, %v1519_v28  ;;  %v502_v26 = vmul.f32 %v1279_v14, %v1484_v61  ;;  %v492_v24 = vadd.f32 %v490_v30, %v485_v62 }
  0x59   : > { %v493_v36 = vadd.f32 %v491_v0, %v486_v47  ;;  %v496_v4 = vadd.f32 %v494_v23, %v480_v29  ;;  %v497_v5 = vadd.f32 %v495_v9, %v481_v6  ;;  %v500_v57 = vadd.f32 %v498_v13, %v487_v31 }
  0x5a   : > { %v319_v54 = vpack.c.bf16 %v290_v53, %v290_v53  ;;  %v501_v25 = vadd.f32 %v499_v1, %v488_v20  ;;  %v503_v35 = vmul.f32 %v1288_v16, %v1484_v61  ;;  %v505_v7 = vmul.f32 %v1385_v58, %v1677_v56 }
  0x5b   : > { %v506_v63 = vmul.f32 %v1404_v10, %v1677_v56  ;;  %v509_v8 = vmul.f32 %v1385_v58, %v1646_v37  ;;  %v510_v14 = vmul.f32 %v1404_v10, %v1646_v37  ;;  %v513_v21 = vmul.f32 %v1385_v58, %v1553_v44 }
  0x5c   : > { %926 = vmatprep.mubr.msk.bf16.mxu1 %vm391_vm1, %v319_v54  ;;  %v514_v16 = vmul.f32 %v1404_v10, %v1553_v44  ;;  %v517_v61 = vmul.f32 %v1385_v58, %v1519_v28  ;;  %v518_v43 = vmul.f32 %v1404_v10, %v1519_v28  ;;  %v507_v45 = vadd.f32 %v505_v7, %v492_v24 }
  0x5d   : > { %v508_v46 = vadd.f32 %v506_v63, %v493_v36  ;;  %v511_v48 = vadd.f32 %v509_v8, %v496_v4  ;;  %v512_v49 = vadd.f32 %v510_v14, %v497_v5  ;;  %v515_v50 = vadd.f32 %v513_v21, %v500_v57 }
  0x5e   : > { %v516_v19 = vadd.f32 %v514_v16, %v501_v25  ;;  %v519_v11 = vadd.f32 %v517_v61, %v502_v26  ;;  %v520_v42 = vadd.f32 %v518_v43, %v503_v35  ;;  %v521_v12 = vmul.f32 %v1414_v22, %v1677_v56 }
  0x5f   : > { %v522_v58 = vmul.f32 %v1468_v55, %v1677_v56  ;;  %v525_v10 = vmul.f32 %v1414_v22, %v1553_v44  ;;  %v526_v28 = vmul.f32 %v1468_v55, %v1553_v44  ;;  %v1773_v29 = vstv %s1732_s21 }
  0x60   : > { %v534_v31 = vmul.f32 %v1473_v59, %v1603_v41  ;;  %v535_v20 = vmul.f32 %v1478_v60, %v1603_v41  ;;  %v1780_v40 = vstv %s1734_s11  ;;  %v523_v52 = vadd.f32 %v521_v12, %v511_v48 }
  0x61   : > { %v524_v6 = vadd.f32 %v522_v58, %v512_v49  ;;  %v527_v62 = vadd.f32 %v525_v10, %v519_v11  ;;  %v528_v47 = vadd.f32 %v526_v28, %v520_v42  ;;  %v530_v22 = vmul.f32 %v1473_v59, %v1773_v29  ;;  %v1925_v10 = vld [vmem:[#allocation9_spill] sm:$0xff]  ;;  %v1926_v28 = vld [vmem:[#allocation10_spill] sm:$0xff] }
  0x62   : > { %v531_v55 = vmul.f32 %v1478_v60, %v1773_v29  ;;  %v536_v44 = vadd.f32 %v534_v31, %v515_v50  ;;  %v537_v30 = vadd.f32 %v535_v20, %v516_v19  ;;  %v539_v0 = vmul.f32 %v1498_v17, %v1780_v40 }
  0x63   : > { %v540_v23 = vmul.f32 %v1514_v27, %v1780_v40  ;;  %v543_v9 = vmul.f32 %v1498_v17, %v1773_v29  ;;  %v544_v53 = vmul.f32 %v1514_v27, %v1773_v29  ;;  %v532_v13 = vadd.f32 %v530_v22, %v507_v45 }
  0x64   : > { %v533_v59 = vadd.f32 %v531_v55, %v508_v46  ;;  %v547_v60 = vmul.f32 %v1498_v17, %v1646_v37  ;;  %v548_v1 = vmul.f32 %v1514_v27, %v1646_v37  ;;  %v551_v36 = vmul.f32 %v1498_v17, %v1603_v41 }
  0x65   : > { %v545_v26 = vadd.f32 %v543_v9, %v523_v52  ;;  %v546_v24 = vadd.f32 %v544_v53, %v524_v6  ;;  %v552_v4 = vmul.f32 %v1514_v27, %v1603_v41  ;;  %v541_v5 = vadd.f32 %v539_v0, %v532_v13  ;;  %v1927_v52 = vld [vmem:[#allocation11_spill] sm:$0xff] }
  0x66   : > { %v542_v54 = vadd.f32 %v540_v23, %v533_v59  ;;  %v549_v57 = vadd.f32 %v547_v60, %v536_v44  ;;  %v550_v25 = vadd.f32 %v548_v1, %v537_v30  ;;  %v553_v35 = vadd.f32 %v551_v36, %v527_v62 }
  0x67   : > { %v554_v7 = vadd.f32 %v552_v4, %v528_v47  ;;  %v555_v63 = vstv %s1762_s25  ;;  %v560_v8 = vmul.f32 %v1543_v2, %v1780_v40  ;;  %v561_v17 = vmul.f32 %v1548_v3, %v1780_v40 }
  0x68   : > { %v556_v14 = vmul.f32 %v1543_v2, %v555_v63  ;;  %v557_v21 = vmul.f32 %v1548_v3, %v555_v63  ;;  %v564_v27 = vmul.f32 %v1543_v2, %v1677_v56  ;;  %v565_v16 = vmul.f32 %v1548_v3, %v1677_v56 }
  0x69   : > { %v562_v41 = vadd.f32 %v560_v8, %v545_v26  ;;  %v568_v61 = vmul.f32 %v1543_v2, %v1646_v37  ;;  %v569_v43 = vmul.f32 %v1548_v3, %v1646_v37  ;;  %v563_v48 = vadd.f32 %v561_v17, %v546_v24 }
  0x6a   : > { %v558_v45 = vadd.f32 %v556_v14, %v541_v5  ;;  %v559_v46 = vadd.f32 %v557_v21, %v542_v54  ;;  %v566_v49 = vadd.f32 %v564_v27, %v549_v57  ;;  %v567_v50 = vadd.f32 %v565_v16, %v550_v25  ;;  %v1928_v16 = vld [vmem:[#allocation8_spill] sm:$0xff] }
  0x6b   : > { %v570_v19 = vadd.f32 %v568_v61, %v553_v35  ;;  %v571_v11 = vadd.f32 %v569_v43, %v554_v7  ;;  %v572_v42 = vmul.f32 %v1579_v33, %v555_v63  ;;  %v573_v12 = vmul.f32 %v1584_v34, %v555_v63 }
  0x6c   : > { %v576_v58 = vmul.f32 %v1579_v33, %v1677_v56  ;;  %v577_v2 = vmul.f32 %v1584_v34, %v1677_v56  ;;  %v580_v37 = vmul.f32 %v1925_v10, %v1773_v29  ;;  %v581_v31 = vmul.f32 %v1926_v28, %v1773_v29 }
  0x6d   : > { %v574_v3 = vadd.f32 %v572_v42, %v562_v41  ;;  %v584_v20 = vmul.f32 %v1617_v51, %v1780_v40  ;;  %v585_v6 = vmul.f32 %v1927_v52, %v1780_v40  ;;  %v575_v62 = vadd.f32 %v573_v12, %v563_v48 }
  0x6e   : > { %v578_v33 = vadd.f32 %v576_v58, %v570_v19  ;;  %v579_v47 = vadd.f32 %v577_v2, %v571_v11  ;;  %v582_v22 = vadd.f32 %v580_v37, %v566_v49  ;;  %v583_v34 = vadd.f32 %v581_v31, %v567_v50  ;;  %v764_v50 = vld [vmem:[%s1912_s5] sm:$0xff] (%p63_p10)  ;;  %v765_v19 = vld [vmem:[%s1912_s5 + $0x8] sm:$0xff] (%p63_p10)  ;;  %v766_v11 = vld [vmem:[%s1912_s5 + $0x10] sm:$0xff] (%p63_p10) }
  0x6f   : > { %v588_v56 = vmul.f32 %v1617_v51, %v1773_v29  ;;  %v589_v55 = vmul.f32 %v1927_v52, %v1773_v29  ;;  %v592_v44 = vmul.f32 %v1636_v15, %v555_v63  ;;  %v593_v0 = vmul.f32 %v1643_v32, %v555_v63  ;;  %v767_v58 = vld [vmem:[%s1912_s5 + $0x18] sm:$0xff] (%p63_p10)  ;;  %v768_v37 = vld [vmem:[%s1912_s5 + $0x20] sm:$0xff] (%p63_p10)  ;;  %v770_v31 = vld [vmem:[%s1912_s5 + $0x30] sm:$0xff] (%p63_p10) }
  0x70   : > { %v586_v30 = vadd.f32 %v584_v20, %v582_v22  ;;  %v596_v23 = vmul.f32 %v1636_v15, %v1780_v40  ;;  %v597_v9 = vmul.f32 %v1643_v32, %v1780_v40  ;;  %v587_v53 = vadd.f32 %v585_v6, %v583_v34  ;;  %v771_v20 = vld [vmem:[%s1912_s5 + $0x38] sm:$0xff] (%p63_p10)  ;;  %v772_v6 = vld [vmem:[%s1912_s5 + $0x40] sm:$0xff] (%p63_p10) }
  0x71   : > { %v590_v13 = vadd.f32 %v588_v56, %v578_v33  ;;  %v591_v59 = vadd.f32 %v589_v55, %v579_v47  ;;  %v600_v51 = vmul.f32 %v1654_v38, %v555_v63  ;;  %v601_v60 = vmul.f32 %v1659_v39, %v555_v63  ;;  %v774_v47 = vld [vmem:[%s1912_s5 + $0x50] sm:$0xff] (%p63_p10)  ;;  %v775_v22 = vld [vmem:[%s1912_s5 + $0x58] sm:$0xff] (%p63_p10)  ;;  %v776_v56 = vld [vmem:[%s1912_s5 + $0x60] sm:$0xff] (%p63_p10) }
  0x72   : > { %v594_v29 = vadd.f32 %v592_v44, %v586_v30  ;;  %v595_v1 = vadd.f32 %v593_v0, %v587_v53  ;;  %v289_v36 = vmax.f32 %v1714_v18, 0.0  ;;  %v604_v15 = vmax.f32 %v558_v45, %v574_v3  ;;  %v769_v3 = vld [vmem:[%s1912_s5 + $0x28] sm:$0xff] (%p63_p10)  ;;  %v778_v30 = vld [vmem:[%s1912_s5 + $0x70] sm:$0xff] (%p63_p10)  ;;  %v967_v53 = vld [vmem:[%s1913_s6] ss:$0 sm:$0xff] (%p63_p10) }
  0x73   : > { %v598_v26 = vadd.f32 %v596_v23, %v590_v13  ;;  %v599_v24 = vadd.f32 %v597_v9, %v591_v59  ;;  %v605_v54 = vmax.f32 %v559_v46, %v575_v62  ;;  %v611_v25 = vstv %s610_s14  ;;  %v773_v62 = vld [vmem:[%s1912_s5 + $0x48] sm:$0xff] (%p63_p10) }
  0x74   : > { %v318_v57 = vpack.c.bf16 %v289_v36, %v289_v36  ;;  %v1148_v42 = vmov (%p63_p10), 0.0|0.0   ;;  %v1026_v12 = vpack.c.bf16 (%p63_p10), %v765_v19, %v764_v50  ;;  %v1150_v2 = vmov (%p63_p10), 0.0   ;;  %v777_v55 = vld [vmem:[%s1912_s5 + $0x68] sm:$0xff] (%p63_p10) }
  0x75   : > { %v602_v4 = vadd.f32 %v600_v51, %v598_v26  ;;  %v603_v5 = vadd.f32 %v601_v60, %v599_v24  ;;  %1025 = vmatprep.subr.bf16.mxu0 (%p63_p10), %v1148_v42  ;;  %v1029_v10 = vpack.c.bf16 (%p63_p10), %v767_v58, %v766_v11  ;;  %v1032_v28 = vpack.c.bf16 (%p63_p10), %v769_v3, %v768_v37 }
  0x76   : > { %432 = vmatmul.mubr.bf16.vlgmr.msra.gmra.mrb[0].mxu1 %v318_v57  ;;  %v1035_v52 = vpack.c.bf16 (%p63_p10), %v771_v20, %v770_v31  ;;  %v1038_v33 = vpack.c.bf16 (%p63_p10), %v773_v62, %v772_v6  ;;  %v1041_v34 = vpack.c.bf16 (%p63_p10), %v775_v22, %v774_v47  ;;  %v1044_v44 = vpack.c.bf16 (%p63_p10), %v777_v55, %v776_v56 }
  0x77   : > { %v606_v32 = vmax.f32 %v594_v29, %v602_v4  ;;  %v607_v40 = vmax.f32 %v595_v1, %v603_v5 }
  0x79   : > { %v608_v35 = vmax.f32 %v604_v15, %v606_v32  ;;  %v609_v7 = vmax.f32 %v605_v54, %v607_v40 }
  0x7b   : > { %v612_v38 = vadd.f32 %v611_v25, %v608_v35  ;;  %v613_v8 = vadd.f32 %v611_v25, %v609_v7 }
  0x7d   : > { %v615_v39 = vmax.f32 %v613_v8, 0.0  ;;  %v614_v63 = vmax.f32 %v612_v38, 0.0 }
  0x7f   : > { %v644_v14 = vpack.c.bf16 %v615_v39, %v615_v39  ;;  %v643_v21 = vpack.c.bf16 %v614_v63, %v614_v63 }
  0x81   : > { %966 = vmatprep.mubr.msk.bf16.mxu0 %vm391_vm1, %v644_v14 }
  0x82   : > { %755 = vmatmul.mubr.bf16.vlgmr.msra.gmra.mrb[0].mxu0 %v643_v21 }
  0x83   :  { %1022 = vmatprep.mubr.msk.f32.mxu0 (%p63_p10), %vm1149_vm2, %v1150_v2  ;;  %1027 = vmatpush3.bf16.msra.mxu0 (%p63_p10), %v1026_v12 }
  0x84   :  { %1028 = vmatprep.subr.bf16.mxu0 (%p63_p10), %v1148_v42 }
  0x87   :  { %1030 = vmatpush3.bf16.msra.mxu0 (%p63_p10), %v1029_v10 }
  0x88   :  { %1031 = vmatprep.subr.bf16.mxu0 (%p63_p10), %v1148_v42 }
  0x8b   :  { %1033 = vmatpush3.bf16.msra.mxu0 (%p63_p10), %v1032_v28 }
  0x8c   :  { %1034 = vmatprep.subr.bf16.mxu0 (%p63_p10), %v1148_v42 }
  0x8f   :  { %1036 = vmatpush3.bf16.msra.mxu0 (%p63_p10), %v1035_v52 }
  0x90   :  { %1037 = vmatprep.subr.bf16.mxu0 (%p63_p10), %v1148_v42 }
  0x93   :  { %1039 = vmatpush3.bf16.msra.mxu0 (%p63_p10), %v1038_v33 }
  0x94   :  { %1040 = vmatprep.subr.bf16.mxu0 (%p63_p10), %v1148_v42 }
  0x97   :  { %1042 = vmatpush3.bf16.msra.mxu0 (%p63_p10), %v1041_v34 }
  0x98   :  { %1043 = vmatprep.subr.bf16.mxu0 (%p63_p10), %v1148_v42 }
  0x9b   :  { %1045 = vmatpush3.bf16.msra.mxu0 (%p63_p10), %v1044_v44 }
  0x9c   :  { %1046 = vmatprep.subr.bf16.mxu0 (%p63_p10), %v1148_v42 }
 0x149   : > { %v433_v18 = vpop.f32.mrb[0].mxu1 }
 0x14a   : > { %v435_v17 = vpop.f32.mrb[1].mxu1  ;;  %v439_v61 = vadd.f32 %v1928_v16, %v433_v18 }
 0x14b   : > { %v436_v27 = vpop.f32.mrb[2].mxu1 }
 0x14c   : > { %v437_v41 = vpop.f32.mrb[3].mxu1 }
 0x152   :  { %65 = sbr.rel (!%p63_p10) target bundleno = 30 (0x1e), region = 80 }
 0x155   : > { %v756_v43 = vpop.f32.mrb[0].mxu0 }
 0x156   : > { %v762_v45 = vadd.f32 %v756_v43, %v439_v61   ;;  %v758_v46 = vpop.f32.mrb[1].mxu0 }
 0x157   : > { %v759_v48 = vpop.f32.mrb[2].mxu0 }
 0x158   : > { %v760_v49 = vpop.f32.mrb[3].mxu0  ;;  %v1929_v0 = vmov %v762_v45  ;;  %v763_v9 = vmax.f32 (%p63_p10), %v762_v45, 0.0 }
 0x159   :  { %v779_v0 = vld [vmem:[%s1912_s5 + $0x78] sm:$0xff] }
 0x15a   :  { %v1047_v23 = vpack.c.bf16 %v779_v0, %v778_v30 }
 0x15c   :  { %1048 = vmatpush3.bf16.msra.mxu0 %v1047_v23 }
 0x15f   :  { %1023 = vmatmul.mubr.f32.vlgmr.msra.gmra.mrb[0].mxu0 %v763_v9 }
 0x232   :  { %v853_v13 = vpop.f32.mrb[0].mxu0 }
 0x233   :  { %v854_v59 = vadd.f32 %v967_v53, %v853_v13  ;;  %v1024_v51 = vpop.f32.mrb[1].mxu0 }
 0x235   :  { %858 = vst.msk [vmem:[%s1914_s7] sm:$0xff] %vm857_vm3, %v854_v59 }
 0x236   :  { %863 = vsyncpa [#allocation3], 1 }
 0x237   :  { %864 = vsyncpa [#allocation5], 1 }

</bundles_post_ra>
